<compile_context>
chip_gen: v5e
topology: v5e:2x2
jax: 0.10.0
libtpu: 0.0.40
codegen_flags: <defaults>
</compile_context>

<pallas_src>
import jax
import jax.numpy as jnp
from jax.experimental import pallas as pl
from jax.experimental.pallas import tpu as pltpu

HIDDEN = 512
OUT_PAD = 128   # lane-dense padded width for the final (512 -> 1) layer


def _round_up(n, m):
    return ((n + m - 1) // m) * m


def critic_kernel(x_ref, w1_ref, b1_ref, w2_ref, b2_ref,
                  w3_ref, b3_ref, w4_ref, b4_ref, out_ref):
    # bf16 matmul operands -> MXU full throughput; f32 accumulation.
    # tanh / bias-add kept in f32 (v5e VPU/EUP have no bf16 support).
    x = x_ref[...]                                                  # (TB, S) bf16
    h = jnp.tanh(jnp.dot(x, w1_ref[...],
                         preferred_element_type=jnp.float32) + b1_ref[...])
    h = jnp.tanh(jnp.dot(h.astype(jnp.bfloat16), w2_ref[...],
                         preferred_element_type=jnp.float32) + b2_ref[...])
    h = jnp.tanh(jnp.dot(h.astype(jnp.bfloat16), w3_ref[...],
                         preferred_element_type=jnp.float32) + b3_ref[...])
    v = jnp.dot(h.astype(jnp.bfloat16), w4_ref[...],
                preferred_element_type=jnp.float32) + b4_ref[...]
    out_ref[...] = v                                                # (TB, 128) f32, lane-dense store


def critic_forward(x, params, *, block_b=256):
    """x: (B, state_size) float32 -> (B, 1) float32."""
    (w1, b1, w2, b2, w3, b3, w4p, b4p) = params
    B, S = x.shape

    # Batch tile: cap at block_b (fills the MXU M dimension on v6e/v7x),
    # rounded to a multiple of 16 (bf16 sublane packing).
    TB = _round_up(min(B, block_b), 16)
    Bp = _round_up(B, TB)
    if Bp != B:
        x = jnp.pad(x, ((0, Bp - B), (0, 0)))
    xb = x.astype(jnp.bfloat16)

    grid = (Bp // TB,)
    const = lambda i: (0, 0)          # weights/biases: same block every step -> VMEM resident

    flops = 2 * Bp * (S * HIDDEN + HIDDEN * HIDDEN * 2 + HIDDEN * OUT_PAD)
    transcendentals = 3 * Bp * HIDDEN
    bytes_accessed = (
        xb.size * 2
        + (w1.size + w2.size + w3.size + w4p.size) * 2     # bf16 weights
        + (b1.size + b2.size + b3.size + b4p.size) * 4     # f32 biases
        + Bp * OUT_PAD * 4                                  # f32 output slab
    )

    out = pl.pallas_call(
        critic_kernel,
        out_shape=jax.ShapeDtypeStruct((Bp, OUT_PAD), jnp.float32),
        grid=grid,
        in_specs=[
            pl.BlockSpec((TB, S), lambda i: (i, 0)),          # x tile (pipelined)
            pl.BlockSpec((S, HIDDEN), const),                 # w1
            pl.BlockSpec((1, HIDDEN), const),                 # b1
            pl.BlockSpec((HIDDEN, HIDDEN), const),            # w2
            pl.BlockSpec((1, HIDDEN), const),                 # b2
            pl.BlockSpec((HIDDEN, HIDDEN), const),            # w3
            pl.BlockSpec((1, HIDDEN), const),                 # b3
            pl.BlockSpec((HIDDEN, OUT_PAD), const),           # w4 (zero-padded to 128 lanes)
            pl.BlockSpec((1, OUT_PAD), const),                # b4 (zero-padded)
        ],
        out_specs=pl.BlockSpec((TB, OUT_PAD), lambda i: (i, 0)),
        compiler_params=pltpu.CompilerParams(
            dimension_semantics=("parallel",),                # v7x: shard batch tiles across 2 TCs
        ),
        cost_estimate=pl.CostEstimate(
            flops=flops,
            transcendentals=transcendentals,
            bytes_accessed=bytes_accessed,
        ),
    )(xb, w1, b1, w2, b2, w3, b3, w4p, b4p)

    return out[:B, :1]


def init_linear(key, fan_in, fan_out):
    # PyTorch nn.Linear default init: U(-1/sqrt(fan_in), 1/sqrt(fan_in)) for W and b.
    kw, kb = jax.random.split(key)
    bound = 1.0 / (fan_in ** 0.5)
    w = jax.random.uniform(kw, (fan_in, fan_out), jnp.float32, -bound, bound)
    b = jax.random.uniform(kb, (1, fan_out), jnp.float32, -bound, bound)
    return w, b


def make_params(key, state_size, hidden=HIDDEN):
    """Returns kernel-ready params: bf16 weights (in, out) layout, f32 biases,
    final layer zero-padded from width 1 to OUT_PAD lanes."""
    k1, k2, k3, k4 = jax.random.split(key, 4)
    w1, b1 = init_linear(k1, state_size, hidden)
    w2, b2 = init_linear(k2, hidden, hidden)
    w3, b3 = init_linear(k3, hidden, hidden)
    w4, b4 = init_linear(k4, hidden, 1)
    # Pad the (512, 1) head to (512, 128) so the kernel's output store is lane-dense.
    w4p = jnp.pad(w4, ((0, 0), (0, OUT_PAD - 1)))
    b4p = jnp.pad(b4, ((0, 0), (0, OUT_PAD - 1)))
    to_bf16 = lambda w: w.astype(jnp.bfloat16)
    return (to_bf16(w1), b1, to_bf16(w2), b2, to_bf16(w3), b3, to_bf16(w4p), b4p)


def reference_forward(x, params):
    """Pure-JAX reference with the same bf16-operand / f32-accumulate precision."""
    (w1, b1, w2, b2, w3, b3, w4p, b4p) = params
    h = x.astype(jnp.bfloat16)
    h = jnp.tanh(jnp.dot(h, w1, preferred_element_type=jnp.float32) + b1)
    h = jnp.tanh(jnp.dot(h.astype(jnp.bfloat16), w2, preferred_element_type=jnp.float32) + b2)
    h = jnp.tanh(jnp.dot(h.astype(jnp.bfloat16), w3, preferred_element_type=jnp.float32) + b3)
    v = jnp.dot(h.astype(jnp.bfloat16), w4p, preferred_element_type=jnp.float32) + b4p
    return v[:, :1]


if __name__ == "__main__":
    key = jax.random.PRNGKey(0)
    k_params, k_x = jax.random.split(key)

    batch = 8
    state_size = 16   # small synthetic state dimension
    params = make_params(k_params, state_size)
    x = jax.random.normal(k_x, (batch, state_size), jnp.float32)

    value = critic_forward(x, params)
    value = jax.block_until_ready(value)

    ref = reference_forward(x, params)
    assert value.shape == (batch, 1)
    assert jnp.allclose(value, ref, atol=5e-3, rtol=5e-3), "mismatch vs JAX reference"

    print("KERNEL_OK")
</pallas_src>

<mosaic_0001>
module attributes {stable_mosaic.version = 11 : i64} {
  func.func @critic_kernel(%arg0: i32, %arg1: memref<16x16xbf16, #tpu.memory_space<vmem>>, %arg2: memref<16x512xbf16, #tpu.memory_space<vmem>>, %arg3: memref<1x512xf32, #tpu.memory_space<vmem>>, %arg4: memref<512x512xbf16, #tpu.memory_space<vmem>>, %arg5: memref<1x512xf32, #tpu.memory_space<vmem>>, %arg6: memref<512x512xbf16, #tpu.memory_space<vmem>>, %arg7: memref<1x512xf32, #tpu.memory_space<vmem>>, %arg8: memref<512x128xbf16, #tpu.memory_space<vmem>>, %arg9: memref<1x128xf32, #tpu.memory_space<vmem>>, %arg10: memref<16x128xf32, #tpu.memory_space<vmem>>) attributes {dimension_semantics = [#tpu.dimension_semantics<parallel>], iteration_bounds = array<i64: 1>, scalar_prefetch = 0 : i64, scratch_operands = 0 : i64, tpu.core_type = #tpu.core_type<tc>, window_params = [{transform_indices = @transform_0, window_bounds = array<i64: 16, 16>}, {pipeline_mode = #tpu.pipeline_mode<synchronous>, transform_indices = @transform_1, window_bounds = array<i64: 16, 512>}, {pipeline_mode = #tpu.pipeline_mode<synchronous>, transform_indices = @transform_2, window_bounds = array<i64: 1, 512>}, {pipeline_mode = #tpu.pipeline_mode<synchronous>, transform_indices = @transform_3, window_bounds = array<i64: 512, 512>}, {pipeline_mode = #tpu.pipeline_mode<synchronous>, transform_indices = @transform_4, window_bounds = array<i64: 1, 512>}, {pipeline_mode = #tpu.pipeline_mode<synchronous>, transform_indices = @transform_5, window_bounds = array<i64: 512, 512>}, {pipeline_mode = #tpu.pipeline_mode<synchronous>, transform_indices = @transform_6, window_bounds = array<i64: 1, 512>}, {pipeline_mode = #tpu.pipeline_mode<synchronous>, transform_indices = @transform_7, window_bounds = array<i64: 512, 128>}, {pipeline_mode = #tpu.pipeline_mode<synchronous>, transform_indices = @transform_8, window_bounds = array<i64: 1, 128>}, {transform_indices = @transform_9, window_bounds = array<i64: 16, 128>}]} {
    %c0 = arith.constant 0 : index
    %c0_0 = arith.constant 0 : index
    %0 = vector.load %arg1[%c0, %c0_0] : memref<16x16xbf16, #tpu.memory_space<vmem>>, vector<16x16xbf16>
    %c0_1 = arith.constant 0 : index
    %c0_2 = arith.constant 0 : index
    %1 = vector.load %arg2[%c0_1, %c0_2] : memref<16x512xbf16, #tpu.memory_space<vmem>>, vector<16x512xbf16>
    %cst = arith.constant dense<0.000000e+00> : vector<16x512xf32>
    %2 = tpu.matmul %0, %1, %cst {dimension_numbers = #tpu.dot_dimension_numbers<[1], [0], [0], [1], [0, 0, 1, 1], [], []>} : vector<16x16xbf16>, vector<16x512xbf16>, vector<16x512xf32> -> vector<16x512xf32>
    %c0_3 = arith.constant 0 : index
    %c0_4 = arith.constant 0 : index
    %3 = vector.load %arg3[%c0_3, %c0_4] : memref<1x512xf32, #tpu.memory_space<vmem>>, vector<1x512xf32>
    %4 = vector.broadcast %3 : vector<1x512xf32> to vector<16x512xf32>
    %5 = arith.addf %2, %4 : vector<16x512xf32>
    %6 = math.tanh %5 : vector<16x512xf32>
    %7 = arith.truncf %6 : vector<16x512xf32> to vector<16x512xbf16>
    %c0_5 = arith.constant 0 : index
    %c0_6 = arith.constant 0 : index
    %8 = vector.load %arg4[%c0_5, %c0_6] : memref<512x512xbf16, #tpu.memory_space<vmem>>, vector<512x512xbf16>
    %cst_7 = arith.constant dense<0.000000e+00> : vector<16x512xf32>
    %9 = tpu.matmul %7, %8, %cst_7 {dimension_numbers = #tpu.dot_dimension_numbers<[1], [0], [0], [1], [0, 0, 1, 1], [], []>} : vector<16x512xbf16>, vector<512x512xbf16>, vector<16x512xf32> -> vector<16x512xf32>
    %c0_8 = arith.constant 0 : index
    %c0_9 = arith.constant 0 : index
    %10 = vector.load %arg5[%c0_8, %c0_9] : memref<1x512xf32, #tpu.memory_space<vmem>>, vector<1x512xf32>
    %11 = vector.broadcast %10 : vector<1x512xf32> to vector<16x512xf32>
    %12 = arith.addf %9, %11 : vector<16x512xf32>
    %13 = math.tanh %12 : vector<16x512xf32>
    %14 = arith.truncf %13 : vector<16x512xf32> to vector<16x512xbf16>
    %c0_10 = arith.constant 0 : index
    %c0_11 = arith.constant 0 : index
    %15 = vector.load %arg6[%c0_10, %c0_11] : memref<512x512xbf16, #tpu.memory_space<vmem>>, vector<512x512xbf16>
    %cst_12 = arith.constant dense<0.000000e+00> : vector<16x512xf32>
    %16 = tpu.matmul %14, %15, %cst_12 {dimension_numbers = #tpu.dot_dimension_numbers<[1], [0], [0], [1], [0, 0, 1, 1], [], []>} : vector<16x512xbf16>, vector<512x512xbf16>, vector<16x512xf32> -> vector<16x512xf32>
    %c0_13 = arith.constant 0 : index
    %c0_14 = arith.constant 0 : index
    %17 = vector.load %arg7[%c0_13, %c0_14] : memref<1x512xf32, #tpu.memory_space<vmem>>, vector<1x512xf32>
    %18 = vector.broadcast %17 : vector<1x512xf32> to vector<16x512xf32>
    %19 = arith.addf %16, %18 : vector<16x512xf32>
    %20 = math.tanh %19 : vector<16x512xf32>
    %21 = arith.truncf %20 : vector<16x512xf32> to vector<16x512xbf16>
    %c0_15 = arith.constant 0 : index
    %c0_16 = arith.constant 0 : index
    %22 = vector.load %arg8[%c0_15, %c0_16] : memref<512x128xbf16, #tpu.memory_space<vmem>>, vector<512x128xbf16>
    %cst_17 = arith.constant dense<0.000000e+00> : vector<16x128xf32>
    %23 = tpu.matmul %21, %22, %cst_17 {dimension_numbers = #tpu.dot_dimension_numbers<[1], [0], [0], [1], [0, 0, 1, 1], [], []>} : vector<16x512xbf16>, vector<512x128xbf16>, vector<16x128xf32> -> vector<16x128xf32>
    %c0_18 = arith.constant 0 : index
    %c0_19 = arith.constant 0 : index
    %24 = vector.load %arg9[%c0_18, %c0_19] : memref<1x128xf32, #tpu.memory_space<vmem>>, vector<1x128xf32>
    %25 = vector.broadcast %24 : vector<1x128xf32> to vector<16x128xf32>
    %26 = arith.addf %23, %25 : vector<16x128xf32>
    %c0_20 = arith.constant 0 : index
    %c0_21 = arith.constant 0 : index
    %27 = vector.load %arg10[%c0_20, %c0_21] : memref<16x128xf32, #tpu.memory_space<vmem>>, vector<16x128xf32>
    tpu.vector_store %arg10[%c0_20, %c0_21], %26 {strides = array<i32>} : memref<16x128xf32, #tpu.memory_space<vmem>>, vector<16x128xf32>,
    return
  }
  func.func @transform_0(%arg0: i32) -> (i32, i32) {
    %c0_i32 = arith.constant 0 : i32
    %c0_i32_0 = arith.constant 0 : i32
    return %arg0, %c0_i32 : i32, i32
  }
  func.func @transform_1(%arg0: i32) -> (i32, i32) {
    %c0_i32 = arith.constant 0 : i32
    %c0_i32_0 = arith.constant 0 : i32
    %c0_i32_1 = arith.constant 0 : i32
    return %c0_i32, %c0_i32_0 : i32, i32
  }
  func.func @transform_2(%arg0: i32) -> (i32, i32) {
    %c0_i32 = arith.constant 0 : i32
    %c0_i32_0 = arith.constant 0 : i32
    %c0_i32_1 = arith.constant 0 : i32
    return %c0_i32, %c0_i32_0 : i32, i32
  }
  func.func @transform_3(%arg0: i32) -> (i32, i32) {
    %c0_i32 = arith.constant 0 : i32
    %c0_i32_0 = arith.constant 0 : i32
    %c0_i32_1 = arith.constant 0 : i32
    return %c0_i32, %c0_i32_0 : i32, i32
  }
  func.func @transform_4(%arg0: i32) -> (i32, i32) {
    %c0_i32 = arith.constant 0 : i32
    %c0_i32_0 = arith.constant 0 : i32
    %c0_i32_1 = arith.constant 0 : i32
    return %c0_i32, %c0_i32_0 : i32, i32
  }
  func.func @transform_5(%arg0: i32) -> (i32, i32) {
    %c0_i32 = arith.constant 0 : i32
    %c0_i32_0 = arith.constant 0 : i32
    %c0_i32_1 = arith.constant 0 : i32
    return %c0_i32, %c0_i32_0 : i32, i32
  }
  func.func @transform_6(%arg0: i32) -> (i32, i32) {
    %c0_i32 = arith.constant 0 : i32
    %c0_i32_0 = arith.constant 0 : i32
    %c0_i32_1 = arith.constant 0 : i32
    return %c0_i32, %c0_i32_0 : i32, i32
  }
  func.func @transform_7(%arg0: i32) -> (i32, i32) {
    %c0_i32 = arith.constant 0 : i32
    %c0_i32_0 = arith.constant 0 : i32
    %c0_i32_1 = arith.constant 0 : i32
    return %c0_i32, %c0_i32_0 : i32, i32
  }
  func.func @transform_8(%arg0: i32) -> (i32, i32) {
    %c0_i32 = arith.constant 0 : i32
    %c0_i32_0 = arith.constant 0 : i32
    %c0_i32_1 = arith.constant 0 : i32
    return %c0_i32, %c0_i32_0 : i32, i32
  }
  func.func @transform_9(%arg0: i32) -> (i32, i32) {
    %c0_i32 = arith.constant 0 : i32
    %c0_i32_0 = arith.constant 0 : i32
    return %arg0, %c0_i32 : i32, i32
  }
}

</mosaic_0001>

<bundles_post_ra>
// kernel: tpu_custom_call.1
= control target key start
LH: loop header
LB: loop body
LE: loop exit
PB: predicated region body
PF: predicated region fallthrough
CT: control target
= control target key end

     0   :  { %14 = vsyncpa [#allocation3], 0  ;;  %s4512_s0 = inlined_call_operand.hbm [shape: bf16[16,16], index: 0, kind: input, shape index: {}]   ;;  %s4513_s1 = inlined_call_operand.hbm [shape: bf16[16,512], index: 1, kind: input, shape index: {}]   ;;  %s4514_s2 = inlined_call_operand.hbm [shape: f32[1,512], index: 2, kind: input, shape index: {}]   ;;  %s4515_s3 = inlined_call_operand.hbm [shape: bf16[512,512], index: 3, kind: input, shape index: {}]   ;;  %s4516_s4 = inlined_call_operand.hbm [shape: f32[1,512], index: 4, kind: input, shape index: {}]   ;;  %s4517_s5 = inlined_call_operand.hbm [shape: bf16[512,512], index: 5, kind: input, shape index: {}]   ;;  %s4518_s6 = inlined_call_operand.vmem [shape: f32[1,512], index: 6, kind: input, shape index: {}]   ;;  %s4519_s7 = inlined_call_operand.hbm [shape: bf16[512,128], index: 7, kind: input, shape index: {}]   ;;  %s4520_s8 = inlined_call_operand.vmem [shape: f32[1,128], index: 8, kind: input, shape index: {}]   ;;  %s4521_s9 = inlined_call_operand.hbm [shape: f32[16,128], index: 9, kind: output, shape index: {}]  }
   0x1   :  { %15 = vsyncpa [#allocation6], 0 }
   0x2   :  { %16 = vsyncpa [#allocation9], 0 }
   0x3   :  { %17 = vsyncpa [#allocation12], 0  ;;  %s36_s11 = sshll.u32 %s4513_s1, 4  ;;  %s37_s11 = int_to_ptr.hbm [resolvable:$true] %s36_s11 }
   0x4   :  { %18 = vsyncpa [#allocation4], 0  ;;  %s4354_s12 = smov [#allocation5]   ;;  %s60_s16 = sshll.u32 %s4515_s3, 4  ;;  %s61_s16 = int_to_ptr.hbm [resolvable:$true] %s60_s16 }
   0x5   :  { %s38_s13 = sshll.u32 %s4354_s12, 4  ;;  %s4355_s17 = smov 256   ;;  %s39_s13 = int_to_ptr.vmem [resolvable:$true] %s38_s13 }
   0x6   :  { %s4356_s18 = smov 16   ;;  %s4357_s19 = smov [#allocation8]  }
   0x7   :  { %44 = dma.hbm_to_vmem [thread:$0]  %s37_s11, 512, %s39_s13, [#allocation6], %s4355_s17, %s4355_s17, %s4356_s18  }
   0x8   :  { %s62_s20 = sshll.u32 %s4357_s19, 4  ;;  %s84_s23 = sshll.u32 %s4517_s5, 4  ;;  %s63_s20 = int_to_ptr.vmem [resolvable:$true] %s62_s20  ;;  %s85_s23 = int_to_ptr.hbm [resolvable:$true] %s84_s23 }
   0x9   :  { %68 = dma.hbm_to_vmem [thread:$0]  %s61_s16, 16384, %s63_s20, [#allocation9], %s4355_s17, %s4355_s17, %s4356_s18  }
   0xa   :  { %s23_s25 = sshll.u32 %s4512_s0, 4  ;;  %s4358_s26 = smov [#allocation11]   ;;  %s24_s25 = int_to_ptr.hbm [resolvable:$true] %s23_s25 }
   0xb   :  { %s86_s27 = sshll.u32 %s4358_s26, 4  ;;  %s4359_s3 = smov [#allocation2]   ;;  %s87_s27 = int_to_ptr.vmem [resolvable:$true] %s86_s27 }
   0xc   :  { %92 = dma.hbm_to_vmem [thread:$0]  %s85_s23, 16384, %s87_s27, [#allocation12], %s4355_s17, %s4355_s17, %s4356_s18  }
   0xd   :  { %s25_s28 = sshll.u32 %s4359_s3, 4  ;;  %s4360_s29 = smov 64   ;;  %s26_s28 = int_to_ptr.vmem [resolvable:$true] %s25_s28 }
   0xe   :  { %s4361_s30 = smov 4   ;;  %s50_s11 = sshll.u32 %s4514_s2, 4  ;;  %s51_s11 = int_to_ptr.hbm [resolvable:$true] %s50_s11 }
   0xf   :  { %31 = dma.hbm_to_vmem [thread:$0]  %s24_s25, 128, %s26_s28, [#allocation3], %s4360_s29, %s4360_s29, %s4361_s30  }
  0x10   :  { %s4362_s12 = smov [#allocation7]   ;;  %s74_s15 = sshll.u32 %s4516_s4, 4  ;;  %s75_s15 = int_to_ptr.hbm [resolvable:$true] %s74_s15 }
  0x11   :  { %s52_s13 = sshll.u32 %s4362_s12, 4  ;;  %s4363_s16 = smov [#allocation10]   ;;  %s53_s13 = int_to_ptr.vmem [resolvable:$true] %s52_s13 }
  0x12   :  { %55 = dma.hbm_to_vmem [thread:$0]  %s51_s11, 64, %s53_s13, [#allocation6]  }
  0x13   :  { %s76_s17 = sshll.u32 %s4363_s16, 4  ;;  %s99_s20 = sshll.u32 %s4519_s7, 4  ;;  %s77_s17 = int_to_ptr.vmem [resolvable:$true] %s76_s17  ;;  %s100_s20 = int_to_ptr.hbm [resolvable:$true] %s99_s20 }
  0x14   :  { %79 = dma.hbm_to_vmem [thread:$0]  %s75_s15, 64, %s77_s17, [#allocation9]  }
  0x15   :  { %s4364_s2 = smov [#allocation13]  }
  0x16   :  { %s101_s21 = sshll.u32 %s4364_s2, 4  ;;  %s102_s21 = int_to_ptr.vmem [resolvable:$true] %s101_s21 }
  0x17   :  { %107 = dma.hbm_to_vmem [thread:$0]  %s100_s20, 4096, %s102_s21, [#allocation12], %s4360_s29, %s4360_s29, %s4361_s30  }
  0x18   :  { %4344 = dma.done.wait [#allocation3], 128  }
  0x19   :  { %4345 = vsyncadd [#allocation3], 4294967168 }
  0x1a   :  { %4346 = dma.done.wait [#allocation6], 576  }
  0x1b   :  { %4347 = vsyncadd [#allocation6], 4294966720 }
  0x1c   :  { %4348 = dma.done.wait [#allocation9], 16448  }
  0x1d   :  { %4349 = vsyncadd [#allocation9], 4294950848 }
  0x1e   :  { %4350 = dma.done.wait [#allocation12], 20480  }
  0x1f   :  { %4351 = vsyncadd [#allocation12], 4294946816  ;;  %v2626_v0 = vld [vmem:[#allocation5] sm:$0xf]  ;;  %v3799_v1 = vld [vmem:[#allocation5 + $0xc] sm:$0xf0] }
  0x20   :  { %v3797_v2 = vld [vmem:[#allocation5 + $0x4] sm:$0xf]  ;;  %v2627_v3 = vor.u32 %v3799_v1, %v2626_v0  ;;  %v2628_v4 = vld [vmem:[#allocation5 + $0x10] sm:$0xf0]  ;;  %v2634_v5 = vld [vmem:[#allocation5 + $0x8] sm:$0xf] }
  0x21   :  { %v3800_v6 = vld [vmem:[#allocation5 + $0x14] sm:$0xf0]  ;;  %v2631_v7 = vor.u32 %v3797_v2, %v2628_v4  ;;  %v3798_v9 = vld [vmem:[#allocation5 + $0xc] sm:$0xf]  ;;  %v2636_v10 = vld [vmem:[#allocation5 + $0x18] sm:$0xf0] }
  0x22   :  { %v2635_v8 = vor.u32 %v3800_v6, %v2634_v5  ;;  %v3796_v11 = vld [vmem:[#allocation2] sm:$0xff]  ;;  %vm180_vm0 = vcmask 130048   ;;  %191 = vmatpush.bf16.msra.mxu0 %v2627_v3  ;;  %v2639_v12 = vor.u32 %v3798_v9, %v2636_v10  ;;  %v2758_v13 = vld [vmem:[#allocation8 + $0xe0] sm:$0xf]  ;;  %v3831_v14 = vld [vmem:[#allocation8 + $0xec] sm:$0xf0] }
  0x23   :  { %v2886_v15 = vld [vmem:[#allocation8 + $0x1e0] sm:$0xf]  ;;  %205 = vmatpush.bf16.msra.mxu1 %v2631_v7  ;;  %v2759_v16 = vor.u32 %v3831_v14, %v2758_v13  ;;  %v3863_v17 = vld [vmem:[#allocation8 + $0x1ec] sm:$0xf0]  ;;  %s4365_s23 = smov [#allocation14]   ;;  %s2604_s26 = sshll.u32 %s4521_s9, 4  ;;  %s2605_s26 = int_to_ptr.hbm [resolvable:$true] %s2604_s26 }
  0x24   :  { %219 = vmatpush.bf16.msra.mxu2 %v2635_v8  ;;  %v2742_v18 = vld [vmem:[#allocation8 + $0xc0] sm:$0xf]  ;;  %v3827_v19 = vld [vmem:[#allocation8 + $0xcc] sm:$0xf0]  ;;  %233 = vmatpush.bf16.msra.mxu3 %v2639_v12  ;;  %v2887_v20 = vor.u32 %v3863_v17, %v2886_v15  ;;  %s2602_s1 = sshll.u32 %s4365_s23, 4  ;;  %s4367_s27 = smov 8   ;;  %s2603_s1 = int_to_ptr.vmem [resolvable:$true] %s2602_s1 }
  0x25   :  { %v2870_v21 = vld [vmem:[#allocation8 + $0x1c0] sm:$0xf]  ;;  %v3859_v22 = vld [vmem:[#allocation8 + $0x1cc] sm:$0xf0]  ;;  %2640 = vmatmul.msk.bf16.vlgmr.msra.gmra.mxu0 %vm180_vm0, %v3796_v11  ;;  %v2743_v29 = vor.u32 %v3827_v19, %v2742_v18 }
  0x26   :  { %v3014_v23 = vld [vmem:[#allocation8 + $0x2e0] sm:$0xf]  ;;  %v3895_v24 = vld [vmem:[#allocation8 + $0x2ec] sm:$0xf0]  ;;  %2641 = vmatmul.msk.bf16.vlgmr.msra.gmra.mxu1 %vm180_vm0, %v3796_v11  ;;  %1030 = vmatpush.bf16.msrb.mxu0 %v2759_v16  ;;  %v2871_v33 = vor.u32 %v3859_v22, %v2870_v21 }
  0x27   :  { %v3142_v25 = vld [vmem:[#allocation8 + $0x3e0] sm:$0xf]  ;;  %v3927_v26 = vld [vmem:[#allocation8 + $0x3ec] sm:$0xf0]  ;;  %2642 = vmatmul.msk.bf16.vlgmr.msra.gmra.mxu2 %vm180_vm0, %v3796_v11  ;;  %v3015_v27 = vor.u32 %v3895_v24, %v3014_v23  ;;  %2643 = vmatmul.msk.bf16.vlgmr.msra.gmra.mxu3 %vm180_vm0, %v3796_v11 }
  0x28   :  { %v3143_v28 = vor.u32 %v3927_v26, %v3142_v25  ;;  %v2726_v30 = vld [vmem:[#allocation8 + $0xa0] sm:$0xf]  ;;  %v3891_v32 = vld [vmem:[#allocation8 + $0x2cc] sm:$0xf0]  ;;  %1044 = vmatpush.bf16.msrb.mxu1 %v2887_v20 }
  0x29   :  { %v2998_v31 = vld [vmem:[#allocation8 + $0x2c0] sm:$0xf]  ;;  %1058 = vmatpush.bf16.msrb.mxu2 %v3015_v27  ;;  %v3823_v34 = vld [vmem:[#allocation8 + $0xac] sm:$0xf0] }
  0x2a   :  { %v2999_v35 = vor.u32 %v3891_v32, %v2998_v31  ;;  %v3126_v36 = vld [vmem:[#allocation8 + $0x3c0] sm:$0xf]  ;;  %v3923_v37 = vld [vmem:[#allocation8 + $0x3cc] sm:$0xf0]  ;;  %1072 = vmatpush.bf16.msrb.mxu3 %v3143_v28  ;;  %1031 = vmatpush.bf16.msrb.mxu0 %v2743_v29  ;;  %v2727_v44 = vor.u32 %v3823_v34, %v2726_v30 }
  0x2b   :  { %v2854_v38 = vld [vmem:[#allocation8 + $0x1a0] sm:$0xf]  ;;  %v3855_v39 = vld [vmem:[#allocation8 + $0x1ac] sm:$0xf0]  ;;  %v3127_v40 = vor.u32 %v3923_v37, %v3126_v36  ;;  %v2760_v36 = vld [vmem:[#allocation8 + $0xf0] sm:$0xf0] }
  0x2c   :  { %v2982_v41 = vld [vmem:[#allocation8 + $0x2a0] sm:$0xf]  ;;  %v3887_v42 = vld [vmem:[#allocation8 + $0x2ac] sm:$0xf0]  ;;  %1045 = vmatpush.bf16.msrb.mxu1 %v2871_v33  ;;  %v2855_v46 = vor.u32 %v3855_v39, %v2854_v38  ;;  %v3861_v38 = vld [vmem:[#allocation8 + $0x1e4] sm:$0xf] }
  0x2d   :  { %v3110_v43 = vld [vmem:[#allocation8 + $0x3a0] sm:$0xf]  ;;  %v3919_v45 = vld [vmem:[#allocation8 + $0x3ac] sm:$0xf0]  ;;  %1059 = vmatpush.bf16.msrb.mxu2 %v2999_v35  ;;  %v2983_v50 = vor.u32 %v3887_v42, %v2982_v41  ;;  %v3829_v35 = vld [vmem:[#allocation8 + $0xe4] sm:$0xf] }
  0x2e   :  { %v2710_v47 = vld [vmem:[#allocation8 + $0x80] sm:$0xf]  ;;  %v3819_v48 = vld [vmem:[#allocation8 + $0x8c] sm:$0xf0]  ;;  %1073 = vmatpush.bf16.msrb.mxu3 %v3127_v40  ;;  %v3111_v52 = vor.u32 %v3919_v45, %v3110_v43  ;;  %1032 = vmatpush.bf16.msrb.mxu0 %v2727_v44  ;;  %v2888_v39 = vld [vmem:[#allocation8 + $0x1f0] sm:$0xf0] }
  0x2f   :  { %v2838_v49 = vld [vmem:[#allocation8 + $0x180] sm:$0xf]  ;;  %v3851_v51 = vld [vmem:[#allocation8 + $0x18c] sm:$0xf0]  ;;  %v2711_v57 = vor.u32 %v3819_v48, %v2710_v47  ;;  %v3016_v47 = vld [vmem:[#allocation8 + $0x2f0] sm:$0xf0] }
  0x30   :  { %v2966_v53 = vld [vmem:[#allocation8 + $0x280] sm:$0xf]  ;;  %v3883_v54 = vld [vmem:[#allocation8 + $0x28c] sm:$0xf0]  ;;  %1046 = vmatpush.bf16.msrb.mxu1 %v2855_v46  ;;  %v2839_v58 = vor.u32 %v3851_v51, %v2838_v49  ;;  %v3893_v46 = vld [vmem:[#allocation8 + $0x2e4] sm:$0xf]  ;;  %v2763_v49 = vor.u32 %v3829_v35, %v2760_v36 }
  0x31   :  { %v3094_v55 = vld [vmem:[#allocation8 + $0x380] sm:$0xf]  ;;  %v3915_v56 = vld [vmem:[#allocation8 + $0x38c] sm:$0xf0]  ;;  %1060 = vmatpush.bf16.msrb.mxu2 %v2983_v50  ;;  %v2967_v62 = vor.u32 %v3883_v54, %v2966_v53  ;;  %v3925_v50 = vld [vmem:[#allocation8 + $0x3e4] sm:$0xf] }
  0x32   :  { %v2694_v59 = vld [vmem:[#allocation8 + $0x60] sm:$0xf]  ;;  %v3815_v60 = vld [vmem:[#allocation8 + $0x6c] sm:$0xf0]  ;;  %1074 = vmatpush.bf16.msrb.mxu3 %v3111_v52  ;;  %v3095_v0 = vor.u32 %v3915_v56, %v3094_v55  ;;  %1033 = vmatpush.bf16.msrb.mxu0 %v2711_v57  ;;  %v3144_v51 = vld [vmem:[#allocation8 + $0x3f0] sm:$0xf0]  ;;  %v2891_v52 = vor.u32 %v3861_v38, %v2888_v39 }
  0x33   :  { %v2822_v61 = vld [vmem:[#allocation8 + $0x160] sm:$0xf]  ;;  %v3847_v63 = vld [vmem:[#allocation8 + $0x16c] sm:$0xf0]  ;;  %v2695_v5 = vor.u32 %v3815_v60, %v2694_v59  ;;  %v3825_v53 = vld [vmem:[#allocation8 + $0xc4] sm:$0xf]  ;;  %v3019_v59 = vor.u32 %v3893_v46, %v3016_v47  ;;  %v3147_v60 = vor.u32 %v3925_v50, %v3144_v51 }
  0x34   :  { %v2950_v1 = vld [vmem:[#allocation8 + $0x260] sm:$0xf]  ;;  %v3879_v2 = vld [vmem:[#allocation8 + $0x26c] sm:$0xf0]  ;;  %1047 = vmatpush.bf16.msrb.mxu1 %v2839_v58  ;;  %v2823_v6 = vor.u32 %v3847_v63, %v2822_v61  ;;  %v2744_v54 = vld [vmem:[#allocation8 + $0xd0] sm:$0xf0] }
  0x35   :  { %v3078_v3 = vld [vmem:[#allocation8 + $0x360] sm:$0xf]  ;;  %v3911_v4 = vld [vmem:[#allocation8 + $0x36c] sm:$0xf0]  ;;  %1061 = vmatpush.bf16.msrb.mxu2 %v2967_v62  ;;  %v2951_v10 = vor.u32 %v3879_v2, %v2950_v1  ;;  %v3857_v56 = vld [vmem:[#allocation8 + $0x1c4] sm:$0xf]  ;;  %v2747_v61 = vor.u32 %v3825_v53, %v2744_v54 }
  0x36   :  { %v2678_v7 = vld [vmem:[#allocation8 + $0x40] sm:$0xf]  ;;  %v3811_v8 = vld [vmem:[#allocation8 + $0x4c] sm:$0xf0]  ;;  %1075 = vmatpush.bf16.msrb.mxu3 %v3095_v0  ;;  %v3079_v12 = vor.u32 %v3911_v4, %v3078_v3  ;;  %1034 = vmatpush.bf16.msrb.mxu0 %v2695_v5  ;;  %v2872_v57 = vld [vmem:[#allocation8 + $0x1d0] sm:$0xf0] }
  0x37   :  { %v2806_v9 = vld [vmem:[#allocation8 + $0x140] sm:$0xf]  ;;  %v3843_v11 = vld [vmem:[#allocation8 + $0x14c] sm:$0xf0]  ;;  %v2679_v17 = vor.u32 %v3811_v8, %v2678_v7  ;;  %v2875_v62 = vor.u32 %v3857_v56, %v2872_v57  ;;  %v3821_v63 = vld [vmem:[#allocation8 + $0xa4] sm:$0xf] }
  0x38   :  { %v2934_v13 = vld [vmem:[#allocation8 + $0x240] sm:$0xf]  ;;  %v3875_v14 = vld [vmem:[#allocation8 + $0x24c] sm:$0xf0]  ;;  %1048 = vmatpush.bf16.msrb.mxu1 %v2823_v6  ;;  %v2807_v18 = vor.u32 %v3843_v11, %v2806_v9  ;;  %v2728_v0 = vld [vmem:[#allocation8 + $0xb0] sm:$0xf0] }
  0x39   :  { %v3062_v15 = vld [vmem:[#allocation8 + $0x340] sm:$0xf]  ;;  %v3907_v16 = vld [vmem:[#allocation8 + $0x34c] sm:$0xf0]  ;;  %1062 = vmatpush.bf16.msrb.mxu2 %v2951_v10  ;;  %v2935_v22 = vor.u32 %v3875_v14, %v2934_v13  ;;  %v3853_v1 = vld [vmem:[#allocation8 + $0x1a4] sm:$0xf]  ;;  %v2731_v3 = vor.u32 %v3821_v63, %v2728_v0 }
  0x3a   :  { %v2662_v19 = vld [vmem:[#allocation8 + $0x20] sm:$0xf]  ;;  %v3807_v20 = vld [vmem:[#allocation8 + $0x2c] sm:$0xf0]  ;;  %1076 = vmatpush.bf16.msrb.mxu3 %v3079_v12  ;;  %v3063_v24 = vor.u32 %v3907_v16, %v3062_v15  ;;  %1035 = vmatpush.bf16.msrb.mxu0 %v2679_v17  ;;  %v2856_v2 = vld [vmem:[#allocation8 + $0x1b0] sm:$0xf0] }
  0x3b   :  { %v2790_v21 = vld [vmem:[#allocation8 + $0x120] sm:$0xf]  ;;  %v3839_v23 = vld [vmem:[#allocation8 + $0x12c] sm:$0xf0]  ;;  %v2663_v29 = vor.u32 %v3807_v20, %v2662_v19  ;;  %v2859_v4 = vor.u32 %v3853_v1, %v2856_v2  ;;  %v3889_v5 = vld [vmem:[#allocation8 + $0x2c4] sm:$0xf] }
  0x3c   :  { %v2918_v25 = vld [vmem:[#allocation8 + $0x220] sm:$0xf]  ;;  %v3871_v26 = vld [vmem:[#allocation8 + $0x22c] sm:$0xf0]  ;;  %1049 = vmatpush.bf16.msrb.mxu1 %v2807_v18  ;;  %v2791_v33 = vor.u32 %v3839_v23, %v2790_v21  ;;  %v3000_v6 = vld [vmem:[#allocation8 + $0x2d0] sm:$0xf0] }
  0x3d   :  { %v3046_v27 = vld [vmem:[#allocation8 + $0x320] sm:$0xf]  ;;  %v3903_v28 = vld [vmem:[#allocation8 + $0x32c] sm:$0xf0]  ;;  %1063 = vmatpush.bf16.msrb.mxu2 %v2935_v22  ;;  %v2919_v37 = vor.u32 %v3871_v26, %v2918_v25  ;;  %v3921_v7 = vld [vmem:[#allocation8 + $0x3c4] sm:$0xf]  ;;  %v3003_v8 = vor.u32 %v3889_v5, %v3000_v6 }
  0x3e   :  { %v2646_v30 = vld [vmem:[#allocation8] sm:$0xf]  ;;  %v3803_v31 = vld [vmem:[#allocation8 + $0xc] sm:$0xf0]  ;;  %1077 = vmatpush.bf16.msrb.mxu3 %v3063_v24  ;;  %v3047_v40 = vor.u32 %v3903_v28, %v3046_v27  ;;  %1036 = vmatpush.bf16.msrb.mxu0 %v2663_v29  ;;  %v3128_v9 = vld [vmem:[#allocation8 + $0x3d0] sm:$0xf0] }
  0x3f   :  { %v2774_v32 = vld [vmem:[#allocation8 + $0x100] sm:$0xf]  ;;  %v3835_v34 = vld [vmem:[#allocation8 + $0x10c] sm:$0xf0]  ;;  %v2647_v44 = vor.u32 %v3803_v31, %v2646_v30  ;;  %v3131_v10 = vor.u32 %v3921_v7, %v3128_v9  ;;  %v3817_v11 = vld [vmem:[#allocation8 + $0x84] sm:$0xf] }
  0x40   :  { %v2902_v41 = vld [vmem:[#allocation8 + $0x200] sm:$0xf]  ;;  %v3867_v42 = vld [vmem:[#allocation8 + $0x20c] sm:$0xf0]  ;;  %1050 = vmatpush.bf16.msrb.mxu1 %v2791_v33  ;;  %v2775_v48 = vor.u32 %v3835_v34, %v2774_v32  ;;  %v2712_v12 = vld [vmem:[#allocation8 + $0x90] sm:$0xf0] }
  0x41   :  { %v3030_v43 = vld [vmem:[#allocation8 + $0x300] sm:$0xf]  ;;  %v3899_v45 = vld [vmem:[#allocation8 + $0x30c] sm:$0xf0]  ;;  %1064 = vmatpush.bf16.msrb.mxu2 %v2919_v37  ;;  %v2903_v55 = vor.u32 %v3867_v42, %v2902_v41  ;;  %v3849_v13 = vld [vmem:[#allocation8 + $0x184] sm:$0xf]  ;;  %v2715_v14 = vor.u32 %v3817_v11, %v2712_v12 }
  0x42   :  { %1078 = vmatpush.bf16.msrb.mxu3 %v3047_v40  ;;  %v3031_v58 = vor.u32 %v3899_v45, %v3030_v43  ;;  %1037 = vmatpush.bf16.msrb.mxu0 %v2647_v44  ;;  %v2840_v15 = vld [vmem:[#allocation8 + $0x190] sm:$0xf0]  ;;  %v3885_v17 = vld [vmem:[#allocation8 + $0x2a4] sm:$0xf] }
  0x43   :  { %v2843_v16 = vor.u32 %v3849_v13, %v2840_v15  ;;  %v2984_v18 = vld [vmem:[#allocation8 + $0x2b0] sm:$0xf0]  ;;  %v3917_v19 = vld [vmem:[#allocation8 + $0x3a4] sm:$0xf] }
  0x44   :  { %1051 = vmatpush.bf16.msrb.mxu1 %v2775_v48  ;;  %v2987_v20 = vor.u32 %v3885_v17, %v2984_v18  ;;  %v3112_v21 = vld [vmem:[#allocation8 + $0x3b0] sm:$0xf0]  ;;  %v3813_v23 = vld [vmem:[#allocation8 + $0x64] sm:$0xf] }
  0x45   :  { %1065 = vmatpush.bf16.msrb.mxu2 %v2903_v55  ;;  %v3115_v22 = vor.u32 %v3917_v19, %v3112_v21  ;;  %v2696_v24 = vld [vmem:[#allocation8 + $0x70] sm:$0xf0]  ;;  %v3845_v25 = vld [vmem:[#allocation8 + $0x164] sm:$0xf] }
  0x46   :  { %1086 = vmatpush.bf16.msra.mxu0 %v2763_v49  ;;  %1079 = vmatpush.bf16.msrb.mxu3 %v3031_v58  ;;  %v2699_v26 = vor.u32 %v3813_v23, %v2696_v24  ;;  %v2824_v27 = vld [vmem:[#allocation8 + $0x170] sm:$0xf0]  ;;  %v3881_v29 = vld [vmem:[#allocation8 + $0x284] sm:$0xf] }
  0x47   :  { %v2827_v28 = vor.u32 %v3845_v25, %v2824_v27  ;;  %v2968_v30 = vld [vmem:[#allocation8 + $0x290] sm:$0xf0]  ;;  %v3913_v31 = vld [vmem:[#allocation8 + $0x384] sm:$0xf] }
  0x48   :  { %1100 = vmatpush.bf16.msra.mxu1 %v2891_v52  ;;  %v2971_v32 = vor.u32 %v3881_v29, %v2968_v30  ;;  %v3096_v33 = vld [vmem:[#allocation8 + $0x390] sm:$0xf0]  ;;  %v3809_v35 = vld [vmem:[#allocation8 + $0x44] sm:$0xf] }
  0x49   :  { %1114 = vmatpush.bf16.msra.mxu2 %v3019_v59  ;;  %v3099_v34 = vor.u32 %v3913_v31, %v3096_v33  ;;  %v2680_v36 = vld [vmem:[#allocation8 + $0x50] sm:$0xf0]  ;;  %v3841_v37 = vld [vmem:[#allocation8 + $0x144] sm:$0xf]  ;;  %v2766_v31 = vld [vmem:[#allocation8 + $0xe8] sm:$0xf] }
  0x4a   :  { %1128 = vmatpush.bf16.msra.mxu3 %v3147_v60  ;;  %1087 = vmatpush.bf16.msra.mxu0 %v2747_v61  ;;  %v2683_v38 = vor.u32 %v3809_v35, %v2680_v36  ;;  %v2808_v39 = vld [vmem:[#allocation8 + $0x150] sm:$0xf0]  ;;  %v3877_v41 = vld [vmem:[#allocation8 + $0x264] sm:$0xf]  ;;  %v2894_v36 = vld [vmem:[#allocation8 + $0x1e8] sm:$0xf] }
  0x4b   :  { %v2811_v40 = vor.u32 %v3841_v37, %v2808_v39  ;;  %v2952_v42 = vld [vmem:[#allocation8 + $0x270] sm:$0xf0]  ;;  %v3909_v43 = vld [vmem:[#allocation8 + $0x364] sm:$0xf]  ;;  %v3864_v37 = vld [vmem:[#allocation8 + $0x1f4] sm:$0xf0] }
  0x4c   :  { %1101 = vmatpush.bf16.msra.mxu1 %v2875_v62  ;;  %v2955_v44 = vor.u32 %v3877_v41, %v2952_v42  ;;  %v3080_v45 = vld [vmem:[#allocation8 + $0x370] sm:$0xf0]  ;;  %v3805_v47 = vld [vmem:[#allocation8 + $0x24] sm:$0xf] }
  0x4d   :  { %1115 = vmatpush.bf16.msra.mxu2 %v3003_v8  ;;  %v3083_v46 = vor.u32 %v3909_v43, %v3080_v45  ;;  %v2664_v48 = vld [vmem:[#allocation8 + $0x30] sm:$0xf0]  ;;  %v3837_v49 = vld [vmem:[#allocation8 + $0x124] sm:$0xf]  ;;  %v2750_v45 = vld [vmem:[#allocation8 + $0xc8] sm:$0xf] }
  0x4e   :  { %1088 = vmatpush.bf16.msra.mxu0 %v2731_v3  ;;  %1129 = vmatpush.bf16.msra.mxu3 %v3131_v10  ;;  %v2667_v50 = vor.u32 %v3805_v47, %v2664_v48  ;;  %v2792_v51 = vld [vmem:[#allocation8 + $0x130] sm:$0xf0]  ;;  %v3873_v53 = vld [vmem:[#allocation8 + $0x244] sm:$0xf]  ;;  %v2878_v48 = vld [vmem:[#allocation8 + $0x1c8] sm:$0xf] }
  0x4f   :  { %v2795_v52 = vor.u32 %v3837_v49, %v2792_v51  ;;  %v2936_v54 = vld [vmem:[#allocation8 + $0x250] sm:$0xf0]  ;;  %v3905_v55 = vld [vmem:[#allocation8 + $0x344] sm:$0xf]  ;;  %v3860_v49 = vld [vmem:[#allocation8 + $0x1d4] sm:$0xf0] }
  0x50   :  { %1102 = vmatpush.bf16.msra.mxu1 %v2859_v4  ;;  %v2939_v56 = vor.u32 %v3873_v53, %v2936_v54  ;;  %v3064_v57 = vld [vmem:[#allocation8 + $0x350] sm:$0xf0]  ;;  %v3801_v59 = vld [vmem:[#allocation8 + $0x4] sm:$0xf]  ;;  %v3896_v51 = vld [vmem:[#allocation8 + $0x2f4] sm:$0xf0] }
  0x51   :  { %1116 = vmatpush.bf16.msra.mxu2 %v2987_v20  ;;  %v3067_v58 = vor.u32 %v3905_v55, %v3064_v57  ;;  %v2648_v60 = vld [vmem:[#allocation8 + $0x10] sm:$0xf0]  ;;  %v3833_v61 = vld [vmem:[#allocation8 + $0x104] sm:$0xf]  ;;  %v3150_v54 = vld [vmem:[#allocation8 + $0x3e8] sm:$0xf]  ;;  %v2879_v57 = vor.u32 %v3860_v49, %v2878_v48 }
  0x52   :  { %1089 = vmatpush.bf16.msra.mxu0 %v2715_v14  ;;  %1130 = vmatpush.bf16.msra.mxu3 %v3115_v22  ;;  %v2651_v62 = vor.u32 %v3801_v59, %v2648_v60  ;;  %v2776_v63 = vld [vmem:[#allocation8 + $0x110] sm:$0xf0]  ;;  %v3869_v1 = vld [vmem:[#allocation8 + $0x224] sm:$0xf]  ;;  %v145_v14 = vld [vmem:[#allocation7] sm:$0xf] }
  0x53   :  { %v2779_v0 = vor.u32 %v3833_v61, %v2776_v63  ;;  %v2920_v2 = vld [vmem:[#allocation8 + $0x230] sm:$0xf0]  ;;  %v3901_v3 = vld [vmem:[#allocation8 + $0x324] sm:$0xf]  ;;  %v148_v17 = vperm.slane %v145_v14, 1  ;;  %v149_v21 = vperm.slane %v145_v14, 2 }
  0x54   :  { %1103 = vmatpush.bf16.msra.mxu1 %v2843_v16  ;;  %v2923_v4 = vor.u32 %v3869_v1, %v2920_v2  ;;  %v3048_v5 = vld [vmem:[#allocation8 + $0x330] sm:$0xf0]  ;;  %v3865_v7 = vld [vmem:[#allocation8 + $0x204] sm:$0xf]  ;;  %v147_v16 = vperm.slane %v145_v14, 0  ;;  %v150_v24 = vperm.slane %v145_v14, 3 }
  0x55   :  { %1117 = vmatpush.bf16.msra.mxu2 %v2971_v32  ;;  %v3051_v6 = vor.u32 %v3901_v3, %v3048_v5  ;;  %v2904_v8 = vld [vmem:[#allocation8 + $0x210] sm:$0xf0]  ;;  %v3897_v9 = vld [vmem:[#allocation8 + $0x304] sm:$0xf]  ;;  %v3832_v32 = vld [vmem:[#allocation8 + $0xf4] sm:$0xf0] }
  0x56   :  { %1090 = vmatpush.bf16.msra.mxu0 %v2699_v26  ;;  %1131 = vmatpush.bf16.msra.mxu3 %v3099_v34  ;;  %v2907_v10 = vor.u32 %v3865_v7, %v2904_v8  ;;  %v3032_v11 = vld [vmem:[#allocation8 + $0x310] sm:$0xf0]  ;;  %v2767_v41 = vor.u32 %v3832_v32, %v2766_v31  ;;  %v3928_v55 = vld [vmem:[#allocation8 + $0x3f4] sm:$0xf0]  ;;  %v3006_v3 = vld [vmem:[#allocation8 + $0x2c8] sm:$0xf] }
  0x57   :  { %v3035_v12 = vor.u32 %v3897_v9, %v3032_v11  ;;  %v3824_v59 = vld [vmem:[#allocation8 + $0xb4] sm:$0xf0]  ;;  %v3151_v2 = vor.u32 %v3928_v55, %v3150_v54  ;;  %v3134_v7 = vld [vmem:[#allocation8 + $0x3c8] sm:$0xf] }
  0x58   :  { %1104 = vmatpush.bf16.msra.mxu1 %v2827_v28  ;;  %v3856_v63 = vld [vmem:[#allocation8 + $0x1b4] sm:$0xf0]  ;;  %v3102_v31 = vld [vmem:[#allocation8 + $0x388] sm:$0xf] }
  0x59   :  { %1118 = vmatpush.bf16.msra.mxu2 %v2955_v44  ;;  %v2895_v44 = vor.u32 %v3864_v37, %v2894_v36  ;;  %v3924_v8 = vld [vmem:[#allocation8 + $0x3d4] sm:$0xf0]  ;;  %v2814_v37 = vld [vmem:[#allocation8 + $0x148] sm:$0xf] }
  0x5a   :  { %1091 = vmatpush.bf16.msra.mxu0 %v2683_v38  ;;  %1132 = vmatpush.bf16.msra.mxu3 %v3083_v46  ;;  %v3828_v46 = vld [vmem:[#allocation8 + $0xd4] sm:$0xf0]  ;;  %v2670_v48 = vld [vmem:[#allocation8 + $0x28] sm:$0xf] }
  0x5b   :  { %v2751_v53 = vor.u32 %v3828_v46, %v2750_v45  ;;  %v3820_v11 = vld [vmem:[#allocation8 + $0x94] sm:$0xf0]  ;;  %v2942_v54 = vld [vmem:[#allocation8 + $0x248] sm:$0xf] }
  0x5c   :  { %1105 = vmatpush.bf16.msra.mxu1 %v2811_v40  ;;  %v3852_v14 = vld [vmem:[#allocation8 + $0x194] sm:$0xf0] }
  0x5d   :  { %1119 = vmatpush.bf16.msra.mxu2 %v2939_v56  ;;  %v3916_v32 = vld [vmem:[#allocation8 + $0x394] sm:$0xf0] }
  0x5e   :  { %1092 = vmatpush.bf16.msra.mxu0 %v2667_v50  ;;  %1133 = vmatpush.bf16.msra.mxu3 %v3067_v58  ;;  %v3022_v50 = vld [vmem:[#allocation8 + $0x2e8] sm:$0xf]  ;;  %v3912_v45 = vld [vmem:[#allocation8 + $0x374] sm:$0xf0] }
  0x5f   :  { %v2734_v58 = vld [vmem:[#allocation8 + $0xa8] sm:$0xf]  ;;  %v3023_v61 = vor.u32 %v3896_v51, %v3022_v50  ;;  %v3808_v49 = vld [vmem:[#allocation8 + $0x34] sm:$0xf0] }
  0x60   :  { %1106 = vmatpush.bf16.msra.mxu1 %v2795_v52  ;;  %v2798_v51 = vld [vmem:[#allocation8 + $0x128] sm:$0xf]  ;;  %v3876_v55 = vld [vmem:[#allocation8 + $0x254] sm:$0xf0] }
  0x61   :  { %1120 = vmatpush.bf16.msra.mxu2 %v2923_v4  ;;  %v3892_v4 = vld [vmem:[#allocation8 + $0x2d4] sm:$0xf0] }
  0x62   :  { %1093 = vmatpush.bf16.msra.mxu0 %v2651_v62  ;;  %1134 = vmatpush.bf16.msra.mxu3 %v3051_v6  ;;  %v2862_v62 = vld [vmem:[#allocation8 + $0x1a8] sm:$0xf]  ;;  %v2735_v6 = vor.u32 %v3824_v59, %v2734_v58  ;;  %v3908_v58 = vld [vmem:[#allocation8 + $0x354] sm:$0xf0] }
  0x63   :  { %v2863_v9 = vor.u32 %v3856_v63, %v2862_v62  ;;  %v2654_v59 = vld [vmem:[#allocation8 + $0x8] sm:$0xf]  ;;  %v3836_v63 = vld [vmem:[#allocation8 + $0x114] sm:$0xf0] }
  0x64   :  { %1107 = vmatpush.bf16.msra.mxu1 %v2779_v0  ;;  %v2782_v62 = vld [vmem:[#allocation8 + $0x108] sm:$0xf] }
  0x65   :  { %1121 = vmatpush.bf16.msra.mxu2 %v2907_v10  ;;  %v2718_v10 = vld [vmem:[#allocation8 + $0x88] sm:$0xf] }
  0x66   :  { %1135 = vmatpush.bf16.msra.mxu3 %v3035_v12  ;;  %v3007_v12 = vor.u32 %v3892_v4, %v3006_v3  ;;  %v2768_v3 = vld [vmem:[#allocation8 + $0xf8] sm:$0xf0]  ;;  %v3862_v4 = vld [vmem:[#allocation8 + $0x1ec] sm:$0xf] }
  0xa2   :  { %v193_v13 = vpop.f32.mrf.mxu0 }
  0xa3   :  { %v207_v15 = vpop.f32.mrf.mxu1  ;;  %v194_v18 = vadd.f32 %v193_v13, %v147_v16  ;;  %v2846_v13 = vld [vmem:[#allocation8 + $0x188] sm:$0xf] }
  0xa4   :  { %v208_v19 = vadd.f32 %v207_v15, %v148_v17  ;;  %v3135_v15 = vor.u32 %v3924_v8, %v3134_v7  ;;  %v2896_v7 = vld [vmem:[#allocation8 + $0x1f8] sm:$0xf0]  ;;  %v2926_v8 = vld [vmem:[#allocation8 + $0x228] sm:$0xf] }
  0xa5   :  { %4104 = vtanh.f32 %v194_v18  ;;  %v2719_v18 = vor.u32 %v3820_v11, %v2718_v10  ;;  %v3054_v11 = vld [vmem:[#allocation8 + $0x328] sm:$0xf] }
  0xa6   :  { %4106 = vtanh.f32 %v208_v19  ;;  %v3118_v19 = vld [vmem:[#allocation8 + $0x3a8] sm:$0xf] }
  0xaa   :  { %v221_v20 = vpop.f32.mrf.mxu2  ;;  %v235_v22 = vpop.f32.mrf.mxu3 }
  0xab   :  { %v195_v23 = vpop.f32.mrf.mxu0  ;;  %v209_v26 = vpop.f32.mrf.mxu1  ;;  %v222_v28 = vadd.f32 %v221_v20, %v149_v21  ;;  %v236_v29 = vadd.f32 %v235_v22, %v150_v24  ;;  %v3920_v20 = vld [vmem:[#allocation8 + $0x3b4] sm:$0xf0]  ;;  %v2702_v22 = vld [vmem:[#allocation8 + $0x68] sm:$0xf] }
  0xac   :  { %v196_v25 = vadd.f32 %v195_v23, %v147_v16  ;;  %v210_v27 = vadd.f32 %v209_v26, %v148_v17  ;;  %v4105_v33 = vpop.eup %4104  ;;  %v2990_v16 = vld [vmem:[#allocation8 + $0x2a8] sm:$0xf]  ;;  %v3888_v17 = vld [vmem:[#allocation8 + $0x2b4] sm:$0xf0] }
  0xad   :  { %v4107_v38 = vpop.eup %4106  ;;  %v3816_v23 = vld [vmem:[#allocation8 + $0x74] sm:$0xf0] }
  0xae   :  { %4108 = vtanh.f32 %v196_v25  ;;  %v2830_v25 = vld [vmem:[#allocation8 + $0x168] sm:$0xf]  ;;  %v3848_v26 = vld [vmem:[#allocation8 + $0x174] sm:$0xf0] }
  0xaf   :  { %4110 = vtanh.f32 %v210_v27  ;;  %v3119_v27 = vor.u32 %v3920_v20, %v3118_v19  ;;  %v3858_v19 = vld [vmem:[#allocation8 + $0x1cc] sm:$0xf]  ;;  %v2880_v20 = vld [vmem:[#allocation8 + $0x1d8] sm:$0xf0] }
  0xb0   :  { %4112 = vtanh.f32 %v222_v28  ;;  %v2974_v28 = vld [vmem:[#allocation8 + $0x288] sm:$0xf] }
  0xb1   :  { %4114 = vtanh.f32 %v236_v29  ;;  %v3884_v29 = vld [vmem:[#allocation8 + $0x294] sm:$0xf0] }
  0xb2   :  { %v223_v30 = vpop.f32.mrf.mxu2  ;;  %v237_v35 = vpop.f32.mrf.mxu3  ;;  %v2975_v36 = vor.u32 %v3884_v29, %v2974_v28  ;;  %v3926_v29 = vld [vmem:[#allocation8 + $0x3ec] sm:$0xf] }
  0xb3   :  { %v224_v34 = vadd.f32 %v223_v30, %v149_v21  ;;  %v238_v39 = vadd.f32 %v237_v35, %v150_v24  ;;  %v2847_v21 = vor.u32 %v3852_v14, %v2846_v13  ;;  %v2991_v24 = vor.u32 %v3888_v17, %v2990_v16  ;;  %v3812_v35 = vld [vmem:[#allocation8 + $0x54] sm:$0xf0] }
  0xb4   :  { %v4109_v40 = vpop.eup %4108  ;;  %v2703_v30 = vor.u32 %v3816_v23, %v2702_v22  ;;  %v2783_v13 = vor.u32 %v3836_v63, %v2782_v62  ;;  %v2899_v16 = vor.u32 %v3862_v4, %v2896_v7  ;;  %v2910_v22 = vld [vmem:[#allocation8 + $0x208] sm:$0xf]  ;;  %v3868_v23 = vld [vmem:[#allocation8 + $0x214] sm:$0xf0]  ;;  %v3846_v63 = vld [vmem:[#allocation8 + $0x16c] sm:$0xf] }
  0xb5   :  { %4116 = vtanh.f32 %v224_v34  ;;  %v4111_v42 = vpop.eup %4110  ;;  %v4443_v43 = vpack.c.bf16 %v4109_v40, %v4105_v33  ;;  %v2831_v33 = vor.u32 %v3848_v26, %v2830_v25  ;;  %v2686_v34 = vld [vmem:[#allocation8 + $0x48] sm:$0xf]  ;;  %v3900_v25 = vld [vmem:[#allocation8 + $0x314] sm:$0xf0]  ;;  %v3894_v26 = vld [vmem:[#allocation8 + $0x2ec] sm:$0xf] }
  0xb6   :  { %4118 = vtanh.f32 %v238_v39  ;;  %v4445_v47 = vpack.c.bf16 %v4111_v42, %v4107_v38  ;;  %v4113_v52 = vpop.eup %4112  ;;  %v3844_v38 = vld [vmem:[#allocation8 + $0x154] sm:$0xf0]  ;;  %v3103_v39 = vor.u32 %v3916_v32, %v3102_v31  ;;  %v2958_v40 = vld [vmem:[#allocation8 + $0x268] sm:$0xf]  ;;  %v2687_v42 = vor.u32 %v3812_v35, %v2686_v34  ;;  %v2736_v34 = vld [vmem:[#allocation8 + $0xb8] sm:$0xf0] }
  0xb7   :  { %1038 = vmatmul.bf16.vlgmr.msrb.gmra.mxu0 %v4443_v43  ;;  %v4115_v56 = vpop.eup %4114  ;;  %v2815_v46 = vor.u32 %v3844_v38, %v2814_v37  ;;  %v2883_v31 = vor.u32 %v3858_v19, %v2880_v20  ;;  %v2911_v32 = vor.u32 %v3868_v23, %v2910_v22  ;;  %v3854_v37 = vld [vmem:[#allocation8 + $0x1ac] sm:$0xf]  ;;  %v2864_v38 = vld [vmem:[#allocation8 + $0x1b8] sm:$0xf0] }
  0xb8   :  { %1052 = vmatmul.bf16.vlgmr.msrb.gmra.mxu1 %v4445_v47  ;;  %1142 = vmatpush.bf16.msrb.mxu0 %v2767_v41  ;;  %v3880_v41 = vld [vmem:[#allocation8 + $0x274] sm:$0xf0]  ;;  %v2976_v4 = vld [vmem:[#allocation8 + $0x298] sm:$0xf0]  ;;  %v3914_v7 = vld [vmem:[#allocation8 + $0x38c] sm:$0xf] }
  0xb9   :  { %1156 = vmatpush.bf16.msrb.mxu1 %v2895_v44  ;;  %v3086_v44 = vld [vmem:[#allocation8 + $0x368] sm:$0xf]  ;;  %v2959_v50 = vor.u32 %v3880_v41, %v2958_v40  ;;  %v3890_v40 = vld [vmem:[#allocation8 + $0x2cc] sm:$0xf]  ;;  %v3008_v41 = vld [vmem:[#allocation8 + $0x2d8] sm:$0xf0] }
  0xba   :  { %v3910_v19 = vld [vmem:[#allocation8 + $0x36c] sm:$0xf]  ;;  %v3088_v20 = vld [vmem:[#allocation8 + $0x378] sm:$0xf0] }
  0xbb   :  { %v4117_v60 = vpop.eup %4116  ;;  %v3806_v22 = vld [vmem:[#allocation8 + $0x2c] sm:$0xf]  ;;  %v2672_v23 = vld [vmem:[#allocation8 + $0x38] sm:$0xf0] }
  0xbc   :  { %v4119_v0 = vpop.eup %4118  ;;  %v4449_v1 = vpack.c.bf16 %v4117_v60, %v4113_v52  ;;  %1143 = vmatpush.bf16.msrb.mxu0 %v2751_v53  ;;  %v3840_v52 = vld [vmem:[#allocation8 + $0x134] sm:$0xf0]  ;;  %v3087_v53 = vor.u32 %v3912_v45, %v3086_v44  ;;  %v3922_v44 = vld [vmem:[#allocation8 + $0x3cc] sm:$0xf]  ;;  %v3136_v45 = vld [vmem:[#allocation8 + $0x3d8] sm:$0xf0] }
  0xbd   :  { %v4451_v5 = vpack.c.bf16 %v4119_v0, %v4115_v56  ;;  %1157 = vmatpush.bf16.msrb.mxu1 %v2879_v57  ;;  %v2671_v56 = vor.u32 %v3808_v49, %v2670_v48  ;;  %v3070_v57 = vld [vmem:[#allocation8 + $0x348] sm:$0xf]  ;;  %v2799_v60 = vor.u32 %v3840_v52, %v2798_v51  ;;  %v2943_v0 = vor.u32 %v3876_v55, %v2942_v54  ;;  %v3818_v48 = vld [vmem:[#allocation8 + $0x8c] sm:$0xf]  ;;  %v2720_v49 = vld [vmem:[#allocation8 + $0x98] sm:$0xf0] }
  0xbe   :  { %1066 = vmatmul.bf16.vlgmr.msrb.gmra.mxu2 %v4449_v1  ;;  %v3850_v51 = vld [vmem:[#allocation8 + $0x18c] sm:$0xf]  ;;  %v2848_v52 = vld [vmem:[#allocation8 + $0x198] sm:$0xf0] }
  0xbf   :  { %1080 = vmatmul.bf16.vlgmr.msrb.gmra.mxu3 %v4451_v5  ;;  %1170 = vmatpush.bf16.msrb.mxu2 %v3023_v61  ;;  %v3804_v61 = vld [vmem:[#allocation8 + $0x14] sm:$0xf0]  ;;  %v3886_v54 = vld [vmem:[#allocation8 + $0x2ac] sm:$0xf]  ;;  %v2992_v55 = vld [vmem:[#allocation8 + $0x2b8] sm:$0xf0] }
  0xc0   :  { %1184 = vmatpush.bf16.msrb.mxu3 %v3151_v2  ;;  %1144 = vmatpush.bf16.msrb.mxu0 %v2735_v6  ;;  %v3830_v2 = vld [vmem:[#allocation8 + $0xec] sm:$0xf]  ;;  %v3071_v6 = vor.u32 %v3908_v58, %v3070_v57  ;;  %v2655_v10 = vor.u32 %v3804_v61, %v2654_v59  ;;  %v3120_v58 = vld [vmem:[#allocation8 + $0x3b8] sm:$0xf0]  ;;  %v2851_v59 = vor.u32 %v3850_v51, %v2848_v52 }
  0xc1   :  { %1158 = vmatpush.bf16.msrb.mxu1 %v2863_v9  ;;  %v3872_v9 = vld [vmem:[#allocation8 + $0x234] sm:$0xf0]  ;;  %v2771_v14 = vor.u32 %v3830_v2, %v2768_v3  ;;  %v3918_v57 = vld [vmem:[#allocation8 + $0x3ac] sm:$0xf]  ;;  %v2704_v61 = vld [vmem:[#allocation8 + $0x78] sm:$0xf0]  ;;  %v2995_v62 = vor.u32 %v3886_v54, %v2992_v55 }
  0xc2   :  { %v2927_v17 = vor.u32 %v3872_v9, %v2926_v8  ;;  %v3123_v2 = vor.u32 %v3918_v57, %v3120_v58  ;;  %v3882_v3 = vld [vmem:[#allocation8 + $0x28c] sm:$0xf]  ;;  %v3104_v8 = vld [vmem:[#allocation8 + $0x398] sm:$0xf0]  ;;  %v3254_v55 = vld [vmem:[#allocation11 + $0xc0] sm:$0xf] }
  0xc3   :  { %1171 = vmatpush.bf16.msrb.mxu2 %v3007_v12  ;;  %v3904_v12 = vld [vmem:[#allocation8 + $0x334] sm:$0xf0]  ;;  %v3866_v54 = vld [vmem:[#allocation8 + $0x20c] sm:$0xf] }
  0xc4   :  { %1185 = vmatpush.bf16.msrb.mxu3 %v3135_v15  ;;  %1145 = vmatpush.bf16.msrb.mxu0 %v2719_v18  ;;  %v3826_v15 = vld [vmem:[#allocation8 + $0xcc] sm:$0xf]  ;;  %v2752_v18 = vld [vmem:[#allocation8 + $0xd8] sm:$0xf0] }
  0xc5   :  { %1159 = vmatpush.bf16.msrb.mxu1 %v2847_v21  ;;  %v3055_v21 = vor.u32 %v3904_v12, %v3054_v11  ;;  %v2755_v28 = vor.u32 %v3826_v15, %v2752_v18  ;;  %v2688_v11 = vld [vmem:[#allocation8 + $0x58] sm:$0xf0]  ;;  %v2979_v12 = vor.u32 %v3882_v3, %v2976_v4  ;;  %v3107_v15 = vor.u32 %v3914_v7, %v3104_v8  ;;  %v3238_v3 = vld [vmem:[#allocation11 + $0xa0] sm:$0xf]  ;;  %v3951_v4 = vld [vmem:[#allocation11 + $0xac] sm:$0xf0] }
  0xc6   :  { %v3239_v8 = vor.u32 %v3951_v4, %v3238_v3  ;;  %v3989_v4 = vld [vmem:[#allocation11 + $0x1e4] sm:$0xf] }
  0xc7   :  { %1172 = vmatpush.bf16.msrb.mxu2 %v2991_v24  ;;  %1094 = vmatmul.bf16.vlgmr.msra.gmra.mxu0 %v4443_v43  ;;  %v3038_v24 = vld [vmem:[#allocation8 + $0x308] sm:$0xf] }
  0xc8   :  { %1186 = vmatpush.bf16.msrb.mxu3 %v3119_v27  ;;  %1108 = vmatmul.bf16.vlgmr.msra.gmra.mxu1 %v4445_v47  ;;  %v3024_v27 = vld [vmem:[#allocation8 + $0x2f8] sm:$0xf0]  ;;  %v3039_v35 = vor.u32 %v3900_v25, %v3038_v24  ;;  %v3838_v25 = vld [vmem:[#allocation8 + $0x12c] sm:$0xf] }
  0xc9   :  { %1146 = vmatpush.bf16.msrb.mxu0 %v2703_v30  ;;  %1160 = vmatpush.bf16.msrb.mxu1 %v2831_v33  ;;  %v3152_v30 = vld [vmem:[#allocation8 + $0x3f8] sm:$0xf0]  ;;  %v3822_v33 = vld [vmem:[#allocation8 + $0xac] sm:$0xf] }
  0xcb   :  { %1173 = vmatpush.bf16.msrb.mxu2 %v2975_v36  ;;  %v3027_v36 = vor.u32 %v3894_v26, %v3024_v27  ;;  %v2800_v26 = vld [vmem:[#allocation8 + $0x138] sm:$0xf0]  ;;  %v3091_v27 = vor.u32 %v3910_v19, %v3088_v20  ;;  %v3983_v20 = vld [vmem:[#allocation11 + $0x1ac] sm:$0xf0] }
  0xcc   :  { %1187 = vmatpush.bf16.msrb.mxu3 %v3103_v39  ;;  %v3155_v39 = vor.u32 %v3926_v29, %v3152_v30  ;;  %v2944_v29 = vld [vmem:[#allocation8 + $0x258] sm:$0xf0]  ;;  %v2675_v30 = vor.u32 %v3806_v22, %v2672_v23  ;;  %v3931_v22 = vld [vmem:[#allocation11 + $0xc] sm:$0xf0] }
  0xcd   :  { %1147 = vmatpush.bf16.msrb.mxu0 %v2687_v42  ;;  %1161 = vmatpush.bf16.msrb.mxu1 %v2815_v46  ;;  %v2739_v42 = vor.u32 %v3822_v33, %v2736_v34  ;;  %v2867_v46 = vor.u32 %v3854_v37, %v2864_v38  ;;  %v3802_v33 = vld [vmem:[#allocation8 + $0xc] sm:$0xf]  ;;  %v2803_v34 = vor.u32 %v3838_v25, %v2800_v26  ;;  %v2784_v37 = vld [vmem:[#allocation8 + $0x118] sm:$0xf0]  ;;  %v3957_v25 = vld [vmem:[#allocation11 + $0xe4] sm:$0xf] }
  0xce   :  { %1122 = vmatmul.bf16.vlgmr.msra.gmra.mxu2 %v4449_v1  ;;  %v3272_v26 = vld [vmem:[#allocation11 + $0xf0] sm:$0xf0] }
  0xcf   :  { %1136 = vmatmul.bf16.vlgmr.msra.gmra.mxu3 %v4451_v5  ;;  %1174 = vmatpush.bf16.msrb.mxu2 %v2959_v50  ;;  %v3011_v50 = vor.u32 %v3890_v40, %v3008_v41  ;;  %v3270_v40 = vld [vmem:[#allocation11 + $0xe0] sm:$0xf]  ;;  %v3959_v41 = vld [vmem:[#allocation11 + $0xec] sm:$0xf0] }
  0xd0   :  { %1188 = vmatpush.bf16.msrb.mxu3 %v3087_v53  ;;  %v3139_v53 = vor.u32 %v3922_v44, %v3136_v45  ;;  %v2928_v44 = vld [vmem:[#allocation8 + $0x238] sm:$0xf0]  ;;  %v3398_v45 = vld [vmem:[#allocation11 + $0x1e0] sm:$0xf]  ;;  %v3271_v52 = vor.u32 %v3959_v41, %v3270_v40 }
  0xd1   :  { %1148 = vmatpush.bf16.msrb.mxu0 %v2671_v56  ;;  %1162 = vmatpush.bf16.msrb.mxu1 %v2799_v60  ;;  %v2723_v56 = vor.u32 %v3818_v48, %v2720_v49  ;;  %v3814_v60 = vld [vmem:[#allocation8 + $0x6c] sm:$0xf]  ;;  %v3510_v40 = vld [vmem:[#allocation11 + $0x2c0] sm:$0xf] }
  0xd2   :  { %v3902_v49 = vld [vmem:[#allocation8 + $0x32c] sm:$0xf] }
  0xd3   :  { %1175 = vmatpush.bf16.msrb.mxu2 %v2943_v0  ;;  %v2832_v0 = vld [vmem:[#allocation8 + $0x178] sm:$0xf0] }
  0xd4   :  { %1189 = vmatpush.bf16.msrb.mxu3 %v3071_v6  ;;  %v2707_v6 = vor.u32 %v3814_v60, %v2704_v61  ;;  %v2835_v9 = vor.u32 %v3846_v63, %v2832_v0  ;;  %v3382_v60 = vld [vmem:[#allocation11 + $0x1c0] sm:$0xf]  ;;  %v3987_v61 = vld [vmem:[#allocation11 + $0x1cc] sm:$0xf0]  ;;  %v3040_v63 = vld [vmem:[#allocation8 + $0x318] sm:$0xf0] }
  0xd5   :  { %1149 = vmatpush.bf16.msrb.mxu0 %v2655_v10  ;;  %1163 = vmatpush.bf16.msrb.mxu1 %v2783_v13  ;;  %v3810_v10 = vld [vmem:[#allocation8 + $0x4c] sm:$0xf] }
  0xd6   :  { %v3842_v13 = vld [vmem:[#allocation8 + $0x14c] sm:$0xf]  ;;  %v2691_v18 = vor.u32 %v3810_v10, %v2688_v11  ;;  %v3947_v10 = vld [vmem:[#allocation11 + $0x8c] sm:$0xf0] }
  0xd7   :  { %1176 = vmatpush.bf16.msrb.mxu2 %v2927_v17  ;;  %v2960_v17 = vld [vmem:[#allocation8 + $0x278] sm:$0xf0] }
  0xd8   :  { %1190 = vmatpush.bf16.msrb.mxu3 %v3055_v21  ;;  %1150 = vmatmul.bf16.vlgmr.msrb.gmra.mxu0 %v4443_v43 }
  0xd9   :  { %1198 = vmatpush.bf16.msra.mxu0 %v2771_v14  ;;  %1212 = vmatpush.bf16.msra.mxu1 %v2899_v16  ;;  %v2816_v14 = vld [vmem:[#allocation8 + $0x158] sm:$0xf0]  ;;  %v3878_v16 = vld [vmem:[#allocation8 + $0x26c] sm:$0xf] }
  0xda   :  { %1164 = vmatmul.bf16.vlgmr.msrb.gmra.mxu1 %v4445_v47  ;;  %v2819_v21 = vor.u32 %v3842_v13, %v2816_v14  ;;  %v2963_v24 = vor.u32 %v3878_v16, %v2960_v17  ;;  %v3943_v13 = vld [vmem:[#allocation11 + $0x6c] sm:$0xf0]  ;;  %v3190_v14 = vld [vmem:[#allocation11 + $0x40] sm:$0xf] }
  0xdb   :  { %1177 = vmatpush.bf16.msrb.mxu2 %v2911_v32  ;;  %v3072_v32 = vld [vmem:[#allocation8 + $0x358] sm:$0xf0]  ;;  %v3174_v16 = vld [vmem:[#allocation11 + $0x20] sm:$0xf]  ;;  %v3935_v17 = vld [vmem:[#allocation11 + $0x2c] sm:$0xf0] }
  0xdc   :  { %1191 = vmatpush.bf16.msrb.mxu3 %v3039_v35  ;;  %v2656_v35 = vld [vmem:[#allocation8 + $0x18] sm:$0xf0]  ;;  %v3175_v19 = vor.u32 %v3935_v17, %v3174_v16  ;;  %v4003_v16 = vld [vmem:[#allocation11 + $0x24c] sm:$0xf0] }
  0xdd   :  { %1199 = vmatpush.bf16.msra.mxu0 %v2755_v28  ;;  %1213 = vmatpush.bf16.msra.mxu1 %v2883_v31  ;;  %v3874_v28 = vld [vmem:[#allocation8 + $0x24c] sm:$0xf]  ;;  %v2659_v48 = vor.u32 %v3802_v33, %v2656_v35  ;;  %v4023_v33 = vld [vmem:[#allocation11 + $0x2ec] sm:$0xf0]  ;;  %v3256_v35 = vld [vmem:[#allocation11 + $0xd0] sm:$0xf0] }
  0xde   :  { %1178 = vmatmul.bf16.vlgmr.msrb.gmra.mxu2 %v4449_v1  ;;  %v3906_v31 = vld [vmem:[#allocation8 + $0x34c] sm:$0xf]  ;;  %v2947_v38 = vor.u32 %v3874_v28, %v2944_v29  ;;  %v3275_v28 = vor.u32 %v3957_v25, %v3272_v26  ;;  %v3334_v29 = vld [vmem:[#allocation11 + $0x160] sm:$0xf]  ;;  %v3929_v26 = vld [vmem:[#allocation11 + $0x4] sm:$0xf] }
  0xdf   :  { %1226 = vmatpush.bf16.msra.mxu2 %v3027_v36  ;;  %1192 = vmatmul.bf16.vlgmr.msrb.gmra.mxu3 %v4451_v5  ;;  %v3834_v36 = vld [vmem:[#allocation8 + $0x10c] sm:$0xf] }
  0xe0   :  { %1240 = vmatpush.bf16.msra.mxu3 %v3155_v39  ;;  %v3870_v39 = vld [vmem:[#allocation8 + $0x22c] sm:$0xf]  ;;  %v2787_v51 = vor.u32 %v3834_v36, %v2784_v37 }
  0xe1   :  { %1200 = vmatpush.bf16.msra.mxu0 %v2739_v42  ;;  %1214 = vmatpush.bf16.msra.mxu1 %v2867_v46  ;;  %v3075_v42 = vor.u32 %v3906_v31, %v3072_v32  ;;  %v3991_v46 = vld [vmem:[#allocation11 + $0x1ec] sm:$0xf0]  ;;  %v3526_v31 = vld [vmem:[#allocation11 + $0x2e0] sm:$0xf] }
  0xe2   :  { %v3399_v57 = vor.u32 %v3991_v46, %v3398_v45  ;;  %v3527_v36 = vor.u32 %v4023_v33, %v3526_v31  ;;  %v3240_v45 = vld [vmem:[#allocation11 + $0xb0] sm:$0xf0] }
  0xe3   :  { %1227 = vmatpush.bf16.msra.mxu2 %v3011_v50  ;;  %v3056_v50 = vld [vmem:[#allocation8 + $0x338] sm:$0xf0]  ;;  %v3352_v31 = vld [vmem:[#allocation11 + $0x190] sm:$0xf0] }
  0xe4   :  { %1241 = vmatpush.bf16.msra.mxu3 %v3139_v53  ;;  %v2931_v53 = vor.u32 %v3870_v39, %v2928_v44  ;;  %v3059_v58 = vor.u32 %v3902_v49, %v3056_v50  ;;  %v3971_v39 = vld [vmem:[#allocation11 + $0x14c] sm:$0xf0]  ;;  %v3949_v44 = vld [vmem:[#allocation11 + $0xa4] sm:$0xf]  ;;  %v3302_v49 = vld [vmem:[#allocation11 + $0x120] sm:$0xf] }
  0xe5   :  { %1201 = vmatpush.bf16.msra.mxu0 %v2723_v56  ;;  %1215 = vmatpush.bf16.msra.mxu1 %v2851_v59  ;;  %v3955_v56 = vld [vmem:[#allocation11 + $0xcc] sm:$0xf0]  ;;  %v2912_v59 = vld [vmem:[#allocation8 + $0x218] sm:$0xf0] }
  0xe6   :  { %v3255_v0 = vor.u32 %v3955_v56, %v3254_v55  ;;  %v3967_v50 = vld [vmem:[#allocation11 + $0x12c] sm:$0xf0]  ;;  %v3224_v55 = vld [vmem:[#allocation11 + $0x90] sm:$0xf0] }
  0xe7   :  { %1228 = vmatpush.bf16.msra.mxu2 %v2995_v62  ;;  %v3898_v62 = vld [vmem:[#allocation8 + $0x30c] sm:$0xf] }
  0xe8   :  { %1242 = vmatpush.bf16.msra.mxu3 %v3123_v2  ;;  %v2915_v2 = vor.u32 %v3866_v54, %v2912_v59  ;;  %v3043_v7 = vor.u32 %v3898_v62, %v3040_v63  ;;  %v3945_v54 = vld [vmem:[#allocation11 + $0x84] sm:$0xf]  ;;  %v3963_v59 = vld [vmem:[#allocation11 + $0x10c] sm:$0xf0] }
  0xe9   :  { %1202 = vmatpush.bf16.msra.mxu0 %v2707_v6  ;;  %1216 = vmatpush.bf16.msra.mxu1 %v2835_v9  ;;  %v3383_v6 = vor.u32 %v3987_v61, %v3382_v60  ;;  %v3222_v9 = vld [vmem:[#allocation11 + $0x80] sm:$0xf]  ;;  %v4011_v62 = vld [vmem:[#allocation11 + $0x28c] sm:$0xf0]  ;;  %v3941_v63 = vld [vmem:[#allocation11 + $0x64] sm:$0xf] }
  0xea   :  { %v3223_v11 = vor.u32 %v3947_v10, %v3222_v9  ;;  %v3478_v60 = vld [vmem:[#allocation11 + $0x280] sm:$0xf]  ;;  %v4007_v9 = vld [vmem:[#allocation11 + $0x26c] sm:$0xf0] }
  0xeb   :  { %1229 = vmatpush.bf16.msra.mxu2 %v2979_v12  ;;  %v3206_v12 = vld [vmem:[#allocation11 + $0x60] sm:$0xf] }
  0xec   :  { %1243 = vmatpush.bf16.msra.mxu3 %v3107_v15  ;;  %v3939_v15 = vld [vmem:[#allocation11 + $0x4c] sm:$0xf0] }
  0xed   :  { %1203 = vmatpush.bf16.msra.mxu0 %v2691_v18  ;;  %1217 = vmatpush.bf16.msra.mxu1 %v2819_v21  ;;  %v3366_v18 = vld [vmem:[#allocation11 + $0x1a0] sm:$0xf] }
  0xee   :  { %v3367_v21 = vor.u32 %v3983_v20, %v3366_v18  ;;  %v3933_v18 = vld [vmem:[#allocation11 + $0x24] sm:$0xf] }
  0xef   :  { %1230 = vmatpush.bf16.msra.mxu2 %v2963_v24  ;;  %v3979_v24 = vld [vmem:[#allocation11 + $0x18c] sm:$0xf0]  ;;  %v3981_v20 = vld [vmem:[#allocation11 + $0x1a4] sm:$0xf] }
  0xf0   :  { %1244 = vmatpush.bf16.msra.mxu3 %v3091_v27 }
  0xf1   :  { %1204 = vmatpush.bf16.msra.mxu0 %v2675_v30  ;;  %1218 = vmatpush.bf16.msra.mxu1 %v2803_v34  ;;  %v3975_v30 = vld [vmem:[#allocation11 + $0x16c] sm:$0xf0]  ;;  %v3953_v34 = vld [vmem:[#allocation11 + $0xc4] sm:$0xf] }
  0xf2   :  { %v3335_v32 = vor.u32 %v3975_v30, %v3334_v29  ;;  %v3259_v37 = vor.u32 %v3953_v34, %v3256_v35  ;;  %v3414_v34 = vld [vmem:[#allocation11 + $0x200] sm:$0xf]  ;;  %v3995_v35 = vld [vmem:[#allocation11 + $0x20c] sm:$0xf0] }
  0xf3   :  { %1231 = vmatpush.bf16.msra.mxu2 %v2947_v38  ;;  %v3318_v38 = vld [vmem:[#allocation11 + $0x140] sm:$0xf] }
  0xf4   :  { %1245 = vmatpush.bf16.msra.mxu3 %v3075_v42  ;;  %v3319_v41 = vor.u32 %v3971_v39, %v3318_v38  ;;  %v4019_v42 = vld [vmem:[#allocation11 + $0x2cc] sm:$0xf0]  ;;  %v3973_v39 = vld [vmem:[#allocation11 + $0x164] sm:$0xf] }
  0xf5   :  { %1205 = vmatpush.bf16.msra.mxu0 %v2659_v48  ;;  %1219 = vmatpush.bf16.msra.mxu1 %v2787_v51  ;;  %v3511_v46 = vor.u32 %v4019_v42, %v3510_v40  ;;  %v3243_v48 = vor.u32 %v3949_v44, %v3240_v45  ;;  %v3494_v51 = vld [vmem:[#allocation11 + $0x2a0] sm:$0xf]  ;;  %v4055_v38 = vld [vmem:[#allocation11 + $0x3ec] sm:$0xf0]  ;;  %v3336_v40 = vld [vmem:[#allocation11 + $0x170] sm:$0xf0] }
  0xf6   :  { %v3339_v42 = vor.u32 %v3973_v39, %v3336_v40  ;;  %v4021_v44 = vld [vmem:[#allocation11 + $0x2e4] sm:$0xf]  ;;  %v3528_v45 = vld [vmem:[#allocation11 + $0x2f0] sm:$0xf0] }
  0xf7   :  { %1232 = vmatpush.bf16.msra.mxu2 %v2931_v53  ;;  %v4015_v53 = vld [vmem:[#allocation11 + $0x2ac] sm:$0xf0]  ;;  %v3448_v39 = vld [vmem:[#allocation11 + $0x250] sm:$0xf0] }
  0xf8   :  { %1246 = vmatpush.bf16.msra.mxu3 %v3059_v58  ;;  %1206 = vmatmul.bf16.vlgmr.msra.gmra.mxu0 %v4443_v43  ;;  %v3207_v43 = vor.u32 %v3943_v13, %v3206_v12  ;;  %v3495_v56 = vor.u32 %v4015_v53, %v3494_v51  ;;  %v3286_v58 = vld [vmem:[#allocation11 + $0x100] sm:$0xf]  ;;  %v3192_v12 = vld [vmem:[#allocation11 + $0x50] sm:$0xf0]  ;;  %v3985_v13 = vld [vmem:[#allocation11 + $0x1c4] sm:$0xf] }
  0xf9   :  { %2044 = vmatpush.bf16.msrb.mxu0 %v3271_v52  ;;  %2058 = vmatpush.bf16.msrb.mxu1 %v3399_v57  ;;  %v3303_v52 = vor.u32 %v3967_v50, %v3302_v49  ;;  %v3227_v57 = vor.u32 %v3945_v54, %v3224_v55  ;;  %v3287_v61 = vor.u32 %v3963_v59, %v3286_v58  ;;  %v3638_v49 = vld [vmem:[#allocation11 + $0x3c0] sm:$0xf]  ;;  %v4051_v50 = vld [vmem:[#allocation11 + $0x3cc] sm:$0xf0]  ;;  %v3969_v53 = vld [vmem:[#allocation11 + $0x144] sm:$0xf] }
  0xfa   :  { %1220 = vmatmul.bf16.vlgmr.msra.gmra.mxu1 %v4445_v47  ;;  %v3191_v47 = vor.u32 %v3939_v15, %v3190_v14  ;;  %v3384_v14 = vld [vmem:[#allocation11 + $0x1d0] sm:$0xf0]  ;;  %v4017_v55 = vld [vmem:[#allocation11 + $0x2c4] sm:$0xf] }
  0xfb   :  { %1233 = vmatpush.bf16.msra.mxu2 %v2915_v2  ;;  %v3479_v2 = vor.u32 %v4011_v62, %v3478_v60  ;;  %v3387_v15 = vor.u32 %v3985_v13, %v3384_v14  ;;  %v3320_v54 = vld [vmem:[#allocation11 + $0x150] sm:$0xf0]  ;;  %v4047_v62 = vld [vmem:[#allocation11 + $0x3ac] sm:$0xf0] }
  0xfc   :  { %1247 = vmatpush.bf16.msra.mxu3 %v3043_v7  ;;  %v4043_v13 = vld [vmem:[#allocation11 + $0x38c] sm:$0xf0] }
  0xfd   :  { %2045 = vmatpush.bf16.msrb.mxu0 %v3255_v0  ;;  %2059 = vmatpush.bf16.msrb.mxu1 %v3383_v6  ;;  %v3208_v0 = vld [vmem:[#allocation11 + $0x70] sm:$0xf0] }
  0xfe   :  { %1234 = vmatmul.bf16.vlgmr.msra.gmra.mxu2 %v4449_v1  ;;  %v3158_v1 = vld [vmem:[#allocation11] sm:$0xf]  ;;  %v3211_v3 = vor.u32 %v3941_v63, %v3208_v0  ;;  %v3400_v6 = vld [vmem:[#allocation11 + $0x1f0] sm:$0xf0] }
  0xff   :  { %1248 = vmatmul.bf16.vlgmr.msra.gmra.mxu3 %v4451_v5  ;;  %v3350_v5 = vld [vmem:[#allocation11 + $0x180] sm:$0xf]  ;;  %v3159_v23 = vor.u32 %v3931_v22, %v3158_v1  ;;  %2072 = vmatpush.bf16.msrb.mxu2 %v3527_v36  ;;  %v3403_v7 = vor.u32 %v3989_v4, %v3400_v6  ;;  %v3368_v1 = vld [vmem:[#allocation11 + $0x1b0] sm:$0xf0]  ;;  %v4013_v4 = vld [vmem:[#allocation11 + $0x2a4] sm:$0xf] }
 0x100   :  { %v3351_v27 = vor.u32 %v3979_v24, %v3350_v5  ;;  %v3371_v22 = vor.u32 %v3981_v20, %v3368_v1  ;;  %v3430_v5 = vld [vmem:[#allocation11 + $0x220] sm:$0xf] }
 0x101   :  { %2046 = vmatpush.bf16.msrb.mxu0 %v3239_v8  ;;  %2060 = vmatpush.bf16.msrb.mxu1 %v3367_v21  ;;  %v3462_v8 = vld [vmem:[#allocation11 + $0x260] sm:$0xf] }
 0x102   :  { %v3463_v10 = vor.u32 %v4007_v9, %v3462_v8  ;;  %v3654_v36 = vld [vmem:[#allocation11 + $0x3e0] sm:$0xf]  ;;  %v3496_v8 = vld [vmem:[#allocation11 + $0x2b0] sm:$0xf0] }
 0x103   :  { %2073 = vmatpush.bf16.msrb.mxu2 %v3511_v46  ;;  %v3590_v1 = vld [vmem:[#allocation11 + $0x360] sm:$0xf] }
 0x105   :  { %2047 = vmatpush.bf16.msrb.mxu0 %v3223_v11  ;;  %2061 = vmatpush.bf16.msrb.mxu1 %v3351_v27  ;;  %v3937_v11 = vld [vmem:[#allocation11 + $0x44] sm:$0xf]  ;;  %v3160_v27 = vld [vmem:[#allocation11 + $0x10] sm:$0xf0] }
 0x106   :  { %v3163_v30 = vor.u32 %v3929_v26, %v3160_v27  ;;  %v4005_v26 = vld [vmem:[#allocation11 + $0x264] sm:$0xf]  ;;  %v3464_v27 = vld [vmem:[#allocation11 + $0x270] sm:$0xf0] }
 0x107   :  { %2074 = vmatpush.bf16.msrb.mxu2 %v3495_v56  ;;  %v3323_v56 = vor.u32 %v3969_v53, %v3320_v54 }
 0x109   :  { %2048 = vmatpush.bf16.msrb.mxu0 %v3207_v43  ;;  %2062 = vmatpush.bf16.msrb.mxu1 %v3335_v32  ;;  %v3195_v43 = vor.u32 %v3937_v11, %v3192_v12  ;;  %v4467_v32 = vld [vmem:[#allocation10] sm:$0xf]  ;;  %v3606_v12 = vld [vmem:[#allocation11 + $0x380] sm:$0xf] }
 0x10a   :  { %v382_v46 = vperm.slane %v4467_v32, 0 }
 0x10b   :  { %2075 = vmatpush.bf16.msrb.mxu2 %v3479_v2  ;;  %v3965_v2 = vld [vmem:[#allocation11 + $0x124] sm:$0xf] }
 0x10d   :  { %2049 = vmatpush.bf16.msrb.mxu0 %v3191_v47  ;;  %2063 = vmatpush.bf16.msrb.mxu1 %v3319_v41  ;;  %v3446_v47 = vld [vmem:[#allocation11 + $0x240] sm:$0xf]  ;;  %v3655_v41 = vor.u32 %v4055_v38, %v3654_v36  ;;  %v4001_v38 = vld [vmem:[#allocation11 + $0x244] sm:$0xf] }
 0x10e   :  { %v3447_v17 = vor.u32 %v4003_v16, %v3446_v47  ;;  %v3961_v47 = vld [vmem:[#allocation11 + $0x104] sm:$0xf]  ;;  %v3288_v16 = vld [vmem:[#allocation11 + $0x110] sm:$0xf0]  ;;  %v3451_v40 = vor.u32 %v4001_v38, %v3448_v39 }
 0x10f   :  { %2076 = vmatpush.bf16.msrb.mxu2 %v3463_v10  ;;  %2086 = vmatpush.bf16.msrb.mxu3 %v3655_v41  ;;  %v3499_v10 = vor.u32 %v4013_v4, %v3496_v8  ;;  %v3993_v4 = vld [vmem:[#allocation11 + $0x204] sm:$0xf]  ;;  %v3608_v38 = vld [vmem:[#allocation11 + $0x390] sm:$0xf0] }
 0x111   :  { %2050 = vmatpush.bf16.msrb.mxu0 %v3175_v19  ;;  %2064 = vmatpush.bf16.msrb.mxu1 %v3303_v52  ;;  %v3176_v19 = vld [vmem:[#allocation11 + $0x30] sm:$0xf0]  ;;  %v3639_v52 = vor.u32 %v4051_v50, %v3638_v49  ;;  %v3997_v50 = vld [vmem:[#allocation11 + $0x224] sm:$0xf] }
 0x112   :  { %v3179_v21 = vor.u32 %v3933_v18, %v3176_v19  ;;  %v3291_v18 = vor.u32 %v3961_v47, %v3288_v16  ;;  %v3480_v19 = vld [vmem:[#allocation11 + $0x290] sm:$0xf0]  ;;  %v3952_v47 = vld [vmem:[#allocation11 + $0xb4] sm:$0xf0]  ;;  %v4049_v16 = vld [vmem:[#allocation11 + $0x3c4] sm:$0xf] }
 0x113   :  { %2077 = vmatpush.bf16.msrb.mxu2 %v3447_v17  ;;  %2087 = vmatpush.bf16.msrb.mxu3 %v3639_v52  ;;  %v4009_v17 = vld [vmem:[#allocation11 + $0x284] sm:$0xf] }
 0x114   :  { %v3483_v20 = vor.u32 %v4009_v17, %v3480_v19  ;;  %v3640_v17 = vld [vmem:[#allocation11 + $0x3d0] sm:$0xf0] }
 0x115   :  { %2051 = vmatpush.bf16.msrb.mxu0 %v3159_v23  ;;  %2065 = vmatpush.bf16.msrb.mxu1 %v3287_v61  ;;  %v3999_v23 = vld [vmem:[#allocation11 + $0x22c] sm:$0xf0]  ;;  %v3622_v61 = vld [vmem:[#allocation11 + $0x3a0] sm:$0xf] }
 0x116   :  { %v3431_v25 = vor.u32 %v3999_v23, %v3430_v5  ;;  %v3623_v0 = vor.u32 %v4047_v62, %v3622_v61  ;;  %v3956_v61 = vld [vmem:[#allocation11 + $0xd4] sm:$0xf0]  ;;  %v3542_v62 = vld [vmem:[#allocation11 + $0x300] sm:$0xf] }
 0x118   :  { %2078 = vmatpush.bf16.msrb.mxu2 %v3431_v25  ;;  %2088 = vmatpush.bf16.msrb.mxu3 %v3623_v0 }
 0x119   :  { %2100 = vmatpush.bf16.msra.mxu0 %v3275_v28  ;;  %2114 = vmatpush.bf16.msra.mxu1 %v3403_v7  ;;  %v3977_v28 = vld [vmem:[#allocation11 + $0x184] sm:$0xf] }
 0x11a   :  { %v3355_v33 = vor.u32 %v3977_v28, %v3352_v31  ;;  %v383_v31 = vperm.slane %v4467_v32, 1 }
 0x11d   :  { %2101 = vmatpush.bf16.msra.mxu0 %v3259_v37  ;;  %2115 = vmatpush.bf16.msra.mxu1 %v3387_v15  ;;  %v3415_v37 = vor.u32 %v3995_v35, %v3414_v34  ;;  %v3607_v15 = vor.u32 %v4043_v13, %v3606_v12  ;;  %v3574_v34 = vld [vmem:[#allocation11 + $0x340] sm:$0xf]  ;;  %v4035_v35 = vld [vmem:[#allocation11 + $0x34c] sm:$0xf0] }
 0x11f   :  { %2079 = vmatpush.bf16.msrb.mxu2 %v3415_v37  ;;  %2089 = vmatpush.bf16.msrb.mxu3 %v3607_v15  ;;  %v3575_v37 = vor.u32 %v4035_v35, %v3574_v34 }
 0x121   :  { %2102 = vmatpush.bf16.msra.mxu0 %v3243_v48  ;;  %2116 = vmatpush.bf16.msra.mxu1 %v3371_v22  ;;  %v3531_v48 = vor.u32 %v4021_v44, %v3528_v45  ;;  %v4039_v22 = vld [vmem:[#allocation11 + $0x36c] sm:$0xf0]  ;;  %v3558_v44 = vld [vmem:[#allocation11 + $0x320] sm:$0xf] }
 0x122   :  { %v3591_v25 = vor.u32 %v4039_v22, %v3590_v1  ;;  %v4031_v45 = vld [vmem:[#allocation11 + $0x32c] sm:$0xf0] }
 0x123   :  { %2128 = vmatpush.bf16.msra.mxu2 %v3531_v48  ;;  %v3960_v48 = vld [vmem:[#allocation11 + $0xf4] sm:$0xf0]  ;;  %v3559_v49 = vor.u32 %v4031_v45, %v3558_v44 }
 0x124   :  { %2090 = vmatpush.bf16.msrb.mxu3 %v3591_v25  ;;  %v4045_v25 = vld [vmem:[#allocation11 + $0x3a4] sm:$0xf] }
 0x125   :  { %2103 = vmatpush.bf16.msra.mxu0 %v3227_v57  ;;  %2117 = vmatpush.bf16.msra.mxu1 %v3355_v33  ;;  %v3512_v57 = vld [vmem:[#allocation11 + $0x2d0] sm:$0xf0] }
 0x126   :  { %v3515_v60 = vor.u32 %v4017_v55, %v3512_v57  ;;  %v3262_v57 = vld [vmem:[#allocation11 + $0xc8] sm:$0xf] }
 0x127   :  { %v3263_v13 = vor.u32 %v3956_v61, %v3262_v57 }
 0x128   :  { %2129 = vmatpush.bf16.msra.mxu2 %v3515_v60  ;;  %2091 = vmatpush.bf16.msrb.mxu3 %v3575_v37  ;;  %v4041_v37 = vld [vmem:[#allocation11 + $0x384] sm:$0xf] }
 0x129   :  { %2104 = vmatpush.bf16.msra.mxu0 %v3211_v3  ;;  %2118 = vmatpush.bf16.msra.mxu1 %v3339_v42  ;;  %v3304_v3 = vld [vmem:[#allocation11 + $0x130] sm:$0xf0]  ;;  %v3278_v42 = vld [vmem:[#allocation11 + $0xe8] sm:$0xf] }
 0x12a   :  { %v3307_v7 = vor.u32 %v3965_v2, %v3304_v3  ;;  %v3279_v60 = vor.u32 %v3960_v48, %v3278_v42 }
 0x12c   :  { %2130 = vmatpush.bf16.msra.mxu2 %v3499_v10  ;;  %2092 = vmatpush.bf16.msrb.mxu3 %v3559_v49  ;;  %v3198_v49 = vld [vmem:[#allocation11 + $0x48] sm:$0xf] }
 0x12d   :  { %2105 = vmatpush.bf16.msra.mxu0 %v3195_v43  ;;  %2119 = vmatpush.bf16.msra.mxu1 %v3323_v56 }
 0x130   :  { %2131 = vmatpush.bf16.msra.mxu2 %v3483_v20  ;;  %v3643_v20 = vor.u32 %v4049_v16, %v3640_v17  ;;  %v3980_v16 = vld [vmem:[#allocation11 + $0x194] sm:$0xf0]  ;;  %v4029_v17 = vld [vmem:[#allocation11 + $0x324] sm:$0xf] }
 0x131   :  { %2106 = vmatpush.bf16.msra.mxu0 %v3179_v21  ;;  %2120 = vmatpush.bf16.msra.mxu1 %v3307_v7  ;;  %v4053_v7 = vld [vmem:[#allocation11 + $0x3e4] sm:$0xf] }
 0x134   :  { %v1039_v24 = vpop.f32.mrf.mxu0 }
 0x135   :  { %v1053_v29 = vpop.f32.mrf.mxu1  ;;  %2107 = vmatpush.bf16.msra.mxu0 %v3163_v30  ;;  %v1040_v58 = vadd.f32 %v1039_v24, %v382_v46  ;;  %2121 = vmatpush.bf16.msra.mxu1 %v3291_v18  ;;  %v3467_v30 = vor.u32 %v4005_v26, %v3464_v27  ;;  %v3624_v26 = vld [vmem:[#allocation11 + $0x3b0] sm:$0xf0] }
 0x136   :  { %v3627_v27 = vor.u32 %v4045_v25, %v3624_v26  ;;  %v3534_v25 = vld [vmem:[#allocation11 + $0x2e8] sm:$0xf]  ;;  %v4025_v26 = vld [vmem:[#allocation11 + $0x304] sm:$0xf] }
 0x137   :  { %v1054_v9 = vadd.f32 %v1053_v29, %v1040_v58  ;;  %2132 = vmatpush.bf16.msra.mxu2 %v3467_v30  ;;  %v3214_v30 = vld [vmem:[#allocation11 + $0x68] sm:$0xf] }
 0x13b   :  { %2133 = vmatpush.bf16.msra.mxu2 %v3451_v40  ;;  %v3611_v40 = vor.u32 %v4041_v37, %v3608_v38 }
 0x13c   :  { %v1041_v51 = vpop.f32.mrf.mxu0 }
 0x13d   :  { %v1055_v59 = vpop.f32.mrf.mxu1  ;;  %v1042_v11 = vadd.f32 %v1041_v51, %v382_v46  ;;  %v3432_v51 = vld [vmem:[#allocation11 + $0x230] sm:$0xf0] }
 0x13e   :  { %v3435_v53 = vor.u32 %v3997_v50, %v3432_v51  ;;  %v3940_v50 = vld [vmem:[#allocation11 + $0x54] sm:$0xf0]  ;;  %v3390_v51 = vld [vmem:[#allocation11 + $0x1c8] sm:$0xf] }
 0x13f   :  { %v1056_v21 = vadd.f32 %v1055_v59, %v1042_v11 }
 0x140   :  { %2134 = vmatpush.bf16.msra.mxu2 %v3435_v53 }
 0x141   :  { %v1067_v63 = vpop.f32.mrf.mxu2 }
 0x142   :  { %v1081_v6 = vpop.f32.mrf.mxu3  ;;  %v1068_v43 = vadd.f32 %v1067_v63, %v1054_v9  ;;  %v4027_v63 = vld [vmem:[#allocation11 + $0x30c] sm:$0xf0]  ;;  %v3656_v9 = vld [vmem:[#allocation11 + $0x3f0] sm:$0xf0] }
 0x143   :  { %v3543_v3 = vor.u32 %v4027_v63, %v3542_v62  ;;  %v3659_v11 = vor.u32 %v4053_v7, %v3656_v9  ;;  %v3182_v62 = vld [vmem:[#allocation11 + $0x28] sm:$0xf]  ;;  %v3936_v63 = vld [vmem:[#allocation11 + $0x34] sm:$0xf0]  ;;  %v4033_v7 = vld [vmem:[#allocation11 + $0x344] sm:$0xf] }
 0x144   :  { %v1095_v14 = vpop.f32.mrf.mxu0  ;;  %v1082_v5 = vadd.f32 %v1081_v6, %v1068_v43  ;;  %v3416_v6 = vld [vmem:[#allocation11 + $0x210] sm:$0xf0]  ;;  %v3246_v43 = vld [vmem:[#allocation11 + $0xa8] sm:$0xf] }
 0x145   :  { %v1109_v23 = vpop.f32.mrf.mxu1  ;;  %v1096_v41 = vadd.f32 %v1095_v14, %v383_v31  ;;  %v3419_v8 = vor.u32 %v3993_v4, %v3416_v6  ;;  %2093 = vmatpush.bf16.msrb.mxu3 %v3543_v3  ;;  %v3247_v22 = vor.u32 %v3952_v47, %v3246_v43  ;;  %v3984_v6 = vld [vmem:[#allocation11 + $0x1b4] sm:$0xf0]  ;;  %v3358_v47 = vld [vmem:[#allocation11 + $0x188] sm:$0xf] }
 0x146   :  { %4120 = vtanh.f32 %v1082_v5  ;;  %v3230_v5 = vld [vmem:[#allocation11 + $0x88] sm:$0xf] }
 0x147   :  { %v1110_v55 = vadd.f32 %v1109_v23, %v1096_v41  ;;  %2135 = vmatpush.bf16.msra.mxu2 %v3419_v8  ;;  %v3576_v8 = vld [vmem:[#allocation11 + $0x350] sm:$0xf0] }
 0x149   :  { %v1069_v24 = vpop.f32.mrf.mxu2  ;;  %2142 = vmatpush.bf16.msra.mxu3 %v3659_v11 }
 0x14a   :  { %v1070_v28 = vadd.f32 %v1069_v24, %v1056_v21  ;;  %v1083_v29 = vpop.f32.mrf.mxu3  ;;  %v384_v21 = vperm.slane %v4467_v32, 2  ;;  %v3948_v24 = vld [vmem:[#allocation11 + $0x94] sm:$0xf0] }
 0x14c   :  { %v1084_v33 = vadd.f32 %v1083_v29, %v1070_v28  ;;  %v1097_v36 = vpop.f32.mrf.mxu0  ;;  %v4121_v54 = vpop.eup %4120  ;;  %v3231_v29 = vor.u32 %v3948_v24, %v3230_v5  ;;  %v3342_v5 = vld [vmem:[#allocation11 + $0x168] sm:$0xf] }
 0x14d   :  { %v1111_v56 = vpop.f32.mrf.mxu1  ;;  %v1098_v59 = vadd.f32 %v1097_v36, %v383_v31  ;;  %2143 = vmatpush.bf16.msra.mxu3 %v3643_v20  ;;  %v3944_v31 = vld [vmem:[#allocation11 + $0x74] sm:$0xf0]  ;;  %v3280_v20 = vld [vmem:[#allocation11 + $0xf8] sm:$0xf0] }
 0x14e   :  { %4122 = vtanh.f32 %v1084_v33  ;;  %v3406_v33 = vld [vmem:[#allocation11 + $0x1e8] sm:$0xf]  ;;  %v3992_v36 = vld [vmem:[#allocation11 + $0x1f4] sm:$0xf0] }
 0x14f   :  { %v1112_v12 = vadd.f32 %v1111_v56, %v1098_v59  ;;  %v3407_v48 = vor.u32 %v3992_v36, %v3406_v33  ;;  %v3592_v56 = vld [vmem:[#allocation11 + $0x370] sm:$0xf0] }
 0x151   :  { %v1123_v46 = vpop.f32.mrf.mxu2  ;;  %2144 = vmatpush.bf16.msra.mxu3 %v3627_v27  ;;  %v3544_v27 = vld [vmem:[#allocation11 + $0x310] sm:$0xf0] }
 0x152   :  { %v1137_v52 = vpop.f32.mrf.mxu3  ;;  %v1124_v0 = vadd.f32 %v1123_v46, %v1110_v55  ;;  %v3215_v46 = vor.u32 %v3944_v31, %v3214_v30  ;;  %v4037_v55 = vld [vmem:[#allocation11 + $0x364] sm:$0xf]  ;;  %v3264_v30 = vld [vmem:[#allocation11 + $0xd8] sm:$0xf0]  ;;  %v3547_v31 = vor.u32 %v4025_v26, %v3544_v27  ;;  %v3454_v26 = vld [vmem:[#allocation11 + $0x248] sm:$0xf] }
 0x153   :  { %v3595_v57 = vor.u32 %v4037_v55, %v3592_v56  ;;  %v3502_v55 = vld [vmem:[#allocation11 + $0x2a8] sm:$0xf] }
 0x154   :  { %v4123_v58 = vpop.eup %4122  ;;  %v1138_v14 = vadd.f32 %v1137_v52, %v1124_v0  ;;  %v3374_v0 = vld [vmem:[#allocation11 + $0x1a8] sm:$0xf] }
 0x155   :  { %v4471_v2 = vpack.c.bf16 %v4123_v58, %v4121_v54  ;;  %v1151_v10 = vpop.f32.mrf.mxu0  ;;  %v3988_v54 = vld [vmem:[#allocation11 + $0x1d4] sm:$0xf0]  ;;  %2145 = vmatpush.bf16.msra.mxu3 %v3611_v40  ;;  %v3375_v43 = vor.u32 %v3984_v6, %v3374_v0  ;;  %v3326_v40 = vld [vmem:[#allocation11 + $0x148] sm:$0xf] }
 0x156   :  { %4124 = vtanh.f32 %v1138_v14  ;;  %v1152_v28 = vadd.f32 %v1151_v10, %v384_v21  ;;  %v3391_v61 = vor.u32 %v3988_v54, %v3390_v51  ;;  %v3579_v10 = vor.u32 %v4033_v7, %v3576_v8  ;;  %v3166_v14 = vld [vmem:[#allocation11 + $0x8] sm:$0xf]  ;;  %v3968_v54 = vld [vmem:[#allocation11 + $0x134] sm:$0xf0]  ;;  %v3942_v8 = vld [vmem:[#allocation11 + $0x6c] sm:$0xf] }
 0x157   :  { %2052 = vmatmul.bf16.vlgmr.msrb.gmra.mxu0 %v4471_v2  ;;  %v1165_v23 = vpop.f32.mrf.mxu1  ;;  %v3964_v0 = vld [vmem:[#allocation11 + $0x114] sm:$0xf0] }
 0x158   :  { %2156 = vmatpush.bf16.msrb.mxu0 %v3279_v60  ;;  %v1166_v42 = vadd.f32 %v1165_v23, %v1152_v28  ;;  %v3199_v60 = vor.u32 %v3940_v50, %v3198_v49  ;;  %v3976_v23 = vld [vmem:[#allocation11 + $0x174] sm:$0xf0] }
 0x159   :  { %v1125_v15 = vpop.f32.mrf.mxu2  ;;  %2146 = vmatpush.bf16.msra.mxu3 %v3595_v57  ;;  %v4024_v28 = vld [vmem:[#allocation11 + $0x2f4] sm:$0xf0]  ;;  %v3343_v36 = vor.u32 %v3976_v23, %v3342_v5 }
 0x15a   :  { %v1126_v18 = vadd.f32 %v1125_v15, %v1112_v12  ;;  %v1139_v19 = vpop.f32.mrf.mxu3  ;;  %v3932_v15 = vld [vmem:[#allocation11 + $0x14] sm:$0xf0]  ;;  %v3535_v38 = vor.u32 %v4024_v28, %v3534_v25 }
 0x15b   :  { %v4016_v57 = vld [vmem:[#allocation11 + $0x2b4] sm:$0xf0] }
 0x15c   :  { %v1140_v1 = vadd.f32 %v1139_v19, %v1126_v18  ;;  %2157 = vmatpush.bf16.msrb.mxu0 %v3263_v13  ;;  %v4125_v41 = vpop.eup %4124  ;;  %v3183_v13 = vor.u32 %v3936_v63, %v3182_v62  ;;  %v3560_v18 = vld [vmem:[#allocation11 + $0x330] sm:$0xf0]  ;;  %v3958_v19 = vld [vmem:[#allocation11 + $0xec] sm:$0xf]  ;;  %v3294_v63 = vld [vmem:[#allocation11 + $0x108] sm:$0xf] }
 0x15d   :  { %v1153_v34 = vpop.f32.mrf.mxu0  ;;  %2147 = vmatpush.bf16.msra.mxu3 %v3579_v10  ;;  %v3283_v24 = vor.u32 %v3958_v19, %v3280_v20  ;;  %v4012_v7 = vld [vmem:[#allocation11 + $0x294] sm:$0xf0]  ;;  %v3938_v20 = vld [vmem:[#allocation11 + $0x4c] sm:$0xf] }
 0x15e   :  { %4126 = vtanh.f32 %v1140_v1  ;;  %v1154_v45 = vadd.f32 %v1153_v34, %v384_v21  ;;  %v3563_v21 = vor.u32 %v4029_v17, %v3560_v18  ;;  %v3167_v1 = vor.u32 %v3932_v15, %v3166_v14  ;;  %v4008_v19 = vld [vmem:[#allocation11 + $0x274] sm:$0xf0] }
 0x15f   :  { %v1167_v58 = vpop.f32.mrf.mxu1 }
 0x160   :  { %2158 = vmatpush.bf16.msrb.mxu0 %v3247_v22  ;;  %v1168_v59 = vadd.f32 %v1167_v58, %v1154_v45  ;;  %v3359_v22 = vor.u32 %v3980_v16, %v3358_v47  ;;  %v3950_v45 = vld [vmem:[#allocation11 + $0xac] sm:$0xf]  ;;  %v3470_v16 = vld [vmem:[#allocation11 + $0x268] sm:$0xf] }
 0x161   :  { %v1179_v35 = vpop.f32.mrf.mxu2  ;;  %2148 = vmatpush.bf16.msra.mxu3 %v3563_v21  ;;  %v3946_v58 = vld [vmem:[#allocation11 + $0x8c] sm:$0xf]  ;;  %v3200_v21 = vld [vmem:[#allocation11 + $0x58] sm:$0xf0] }
 0x162   :  { %v1193_v39 = vpop.f32.mrf.mxu3  ;;  %v1180_v52 = vadd.f32 %v1179_v35, %v1166_v42  ;;  %v3518_v42 = vld [vmem:[#allocation11 + $0x2c8] sm:$0xf]  ;;  %v3203_v25 = vor.u32 %v3938_v20, %v3200_v21  ;;  %v3504_v20 = vld [vmem:[#allocation11 + $0x2b8] sm:$0xf0] }
 0x164   :  { %v4127_v44 = vpop.eup %4126  ;;  %2159 = vmatpush.bf16.msrb.mxu0 %v3231_v29  ;;  %v1194_v3 = vadd.f32 %v1193_v39, %v1180_v52  ;;  %v3954_v29 = vld [vmem:[#allocation11 + $0xcc] sm:$0xf]  ;;  %v3310_v52 = vld [vmem:[#allocation11 + $0x128] sm:$0xf] }
 0x165   :  { %v4475_v53 = vpack.c.bf16 %v4127_v44, %v4125_v41  ;;  %v3267_v39 = vor.u32 %v3954_v29, %v3264_v30  ;;  %v3972_v41 = vld [vmem:[#allocation11 + $0x154] sm:$0xf0]  ;;  %2149 = vmatpush.bf16.msra.mxu3 %v3547_v31  ;;  %v3934_v31 = vld [vmem:[#allocation11 + $0x2c] sm:$0xf] }
 0x166   :  { %4128 = vtanh.f32 %v1194_v3  ;;  %v4020_v44 = vld [vmem:[#allocation11 + $0x2d4] sm:$0xf0]  ;;  %v3327_v49 = vor.u32 %v3972_v41, %v3326_v40  ;;  %v3486_v3 = vld [vmem:[#allocation11 + $0x288] sm:$0xf] }
 0x167   :  { %2066 = vmatmul.bf16.vlgmr.msrb.gmra.mxu1 %v4475_v53  ;;  %2108 = vmatmul.bf16.vlgmr.msra.gmra.mxu0 %v4471_v2  ;;  %v3519_v50 = vor.u32 %v4020_v44, %v3518_v42  ;;  %v3487_v15 = vor.u32 %v4012_v7, %v3486_v3  ;;  %v4004_v30 = vld [vmem:[#allocation11 + $0x254] sm:$0xf0]  ;;  %v3438_v42 = vld [vmem:[#allocation11 + $0x228] sm:$0xf] }
 0x168   :  { %2160 = vmatpush.bf16.msrb.mxu0 %v3215_v46  ;;  %2170 = vmatpush.bf16.msrb.mxu1 %v3407_v48  ;;  %v3248_v46 = vld [vmem:[#allocation11 + $0xb8] sm:$0xf0]  ;;  %v385_v48 = vperm.slane %v4467_v32, 3  ;;  %v3503_v32 = vor.u32 %v4016_v57, %v3502_v55  ;;  %v3455_v40 = vor.u32 %v4004_v30, %v3454_v26  ;;  %v3996_v55 = vld [vmem:[#allocation11 + $0x214] sm:$0xf0] }
 0x169   :  { %v1181_v4 = vpop.f32.mrf.mxu2  ;;  %v3251_v51 = vor.u32 %v3950_v45, %v3248_v46  ;;  %v4000_v45 = vld [vmem:[#allocation11 + $0x234] sm:$0xf0]  ;;  %v3930_v46 = vld [vmem:[#allocation11 + $0xc] sm:$0xf]  ;;  %v3662_v57 = vld [vmem:[#allocation11 + $0x3e8] sm:$0xf] }
 0x16a   :  { %v1182_v9 = vadd.f32 %v1181_v4, %v1168_v59  ;;  %v1195_v11 = vpop.f32.mrf.mxu3  ;;  %v3232_v59 = vld [vmem:[#allocation11 + $0x98] sm:$0xf0]  ;;  %v3598_v30 = vld [vmem:[#allocation11 + $0x368] sm:$0xf] }
 0x16b   :  { %v3235_v62 = vor.u32 %v3946_v58, %v3232_v59  ;;  %v4056_v58 = vld [vmem:[#allocation11 + $0x3f4] sm:$0xf0]  ;;  %v3974_v59 = vld [vmem:[#allocation11 + $0x16c] sm:$0xf]  ;;  %v3488_v26 = vld [vmem:[#allocation11 + $0x298] sm:$0xf0] }
 0x16c   :  { %v1196_v12 = vadd.f32 %v1195_v11, %v1182_v9  ;;  %2161 = vmatpush.bf16.msrb.mxu0 %v3199_v60  ;;  %2171 = vmatpush.bf16.msrb.mxu1 %v3391_v61  ;;  %v4129_v33 = vpop.eup %4128  ;;  %v3311_v61 = vor.u32 %v3968_v54, %v3310_v52  ;;  %v3216_v9 = vld [vmem:[#allocation11 + $0x78] sm:$0xf0]  ;;  %v3990_v11 = vld [vmem:[#allocation11 + $0x1ec] sm:$0xf]  ;;  %v3422_v54 = vld [vmem:[#allocation11 + $0x208] sm:$0xf]  ;;  %v3663_v3 = vor.u32 %v4056_v58, %v3662_v57 }
 0x16d   :  { %v3219_v47 = vor.u32 %v3942_v8, %v3216_v9  ;;  %v3646_v8 = vld [vmem:[#allocation11 + $0x3c8] sm:$0xf]  ;;  %v4052_v9 = vld [vmem:[#allocation11 + $0x3d4] sm:$0xf0]  ;;  %v4054_v57 = vld [vmem:[#allocation11 + $0x3ec] sm:$0xf] }
 0x16e   :  { %4130 = vtanh.f32 %v1196_v12  ;;  %v3408_v12 = vld [vmem:[#allocation11 + $0x1f8] sm:$0xf0] }
 0x16f   :  { %v3411_v18 = vor.u32 %v3990_v11, %v3408_v12  ;;  %v3328_v11 = vld [vmem:[#allocation11 + $0x158] sm:$0xf0]  ;;  %v4018_v12 = vld [vmem:[#allocation11 + $0x2cc] sm:$0xf] }
 0x170   :  { %2162 = vmatpush.bf16.msrb.mxu0 %v3183_v13  ;;  %2172 = vmatpush.bf16.msrb.mxu1 %v3375_v43  ;;  %v3295_v43 = vor.u32 %v3964_v0, %v3294_v63  ;;  %v3423_v0 = vor.u32 %v3996_v55, %v3422_v54  ;;  %v4028_v54 = vld [vmem:[#allocation11 + $0x314] sm:$0xf0]  ;;  %v3994_v55 = vld [vmem:[#allocation11 + $0x20c] sm:$0xf]  ;;  %v3664_v58 = vld [vmem:[#allocation11 + $0x3f8] sm:$0xf0] }
 0x174   :  { %v4131_v34 = vpop.eup %4130  ;;  %2163 = vmatpush.bf16.msrb.mxu0 %v3167_v1  ;;  %2173 = vmatpush.bf16.msrb.mxu1 %v3359_v22  ;;  %v3986_v1 = vld [vmem:[#allocation11 + $0x1cc] sm:$0xf]  ;;  %v3392_v22 = vld [vmem:[#allocation11 + $0x1d8] sm:$0xf0] }
 0x175   :  { %v1207_v35 = vpop.f32.mrf.mxu0  ;;  %v4479_v37 = vpack.c.bf16 %v4131_v34, %v4129_v33  ;;  %v3395_v29 = vor.u32 %v3986_v1, %v3392_v22  ;;  %v3184_v33 = vld [vmem:[#allocation11 + $0x38] sm:$0xf0]  ;;  %v3614_v22 = vld [vmem:[#allocation11 + $0x388] sm:$0xf] }
 0x176   :  { %v1208_v60 = vadd.f32 %v1207_v35, %v385_v48  ;;  %v3982_v35 = vld [vmem:[#allocation11 + $0x1ac] sm:$0xf]  ;;  %v3187_v41 = vor.u32 %v3934_v31, %v3184_v33  ;;  %v4040_v31 = vld [vmem:[#allocation11 + $0x374] sm:$0xf0] }
 0x177   :  { %2080 = vmatmul.bf16.vlgmr.msrb.gmra.mxu2 %v4479_v37  ;;  %2122 = vmatmul.bf16.vlgmr.msra.gmra.mxu1 %v4475_v53  ;;  %v1221_v56 = vpop.f32.mrf.mxu1  ;;  %v4006_v33 = vld [vmem:[#allocation11 + $0x26c] sm:$0xf] }
 0x178   :  { %2212 = vmatpush.bf16.msra.mxu0 %v3283_v24  ;;  %2174 = vmatpush.bf16.msrb.mxu1 %v3343_v36  ;;  %v1222_v13 = vadd.f32 %v1221_v56, %v1208_v60  ;;  %v3471_v24 = vor.u32 %v4008_v19, %v3470_v16  ;;  %v3376_v36 = vld [vmem:[#allocation11 + $0x1b8] sm:$0xf0]  ;;  %v4048_v16 = vld [vmem:[#allocation11 + $0x3b4] sm:$0xf0]  ;;  %v4014_v19 = vld [vmem:[#allocation11 + $0x2ac] sm:$0xf] }
 0x179   :  { %2164 = vmatmul.bf16.vlgmr.msrb.gmra.mxu0 %v4471_v2  ;;  %2184 = vmatpush.bf16.msrb.mxu2 %v3535_v38  ;;  %v3379_v44 = vor.u32 %v3982_v35, %v3376_v36  ;;  %v3344_v60 = vld [vmem:[#allocation11 + $0x178] sm:$0xf0]  ;;  %v3507_v1 = vor.u32 %v4014_v19, %v3504_v20  ;;  %v3599_v35 = vor.u32 %v4040_v31, %v3598_v30  ;;  %v4063_v19 = vld [vmem:[#allocation13 + $0x30] sm:$0xff]  ;;  %v4062_v20 = vld [vmem:[#allocation13 + $0x28] sm:$0xff] }
 0x17a   :  { %v4080_v30 = vld [vmem:[#allocation13 + $0xb8] sm:$0xff] }
 0x17c   :  { %2213 = vmatpush.bf16.msra.mxu0 %v3267_v39  ;;  %2175 = vmatpush.bf16.msrb.mxu1 %v3327_v49  ;;  %v3978_v49 = vld [vmem:[#allocation11 + $0x18c] sm:$0xf] }
 0x17d   :  { %2185 = vmatpush.bf16.msrb.mxu2 %v3519_v50  ;;  %v1209_v4 = vpop.f32.mrf.mxu0  ;;  %v3360_v50 = vld [vmem:[#allocation11 + $0x198] sm:$0xf0] }
 0x17e   :  { %v1210_v14 = vadd.f32 %v1209_v4, %v385_v48  ;;  %v3168_v48 = vld [vmem:[#allocation11 + $0x18] sm:$0xf0]  ;;  %v3363_v56 = vor.u32 %v3978_v49, %v3360_v50 }
 0x17f   :  { %v1223_v5 = vpop.f32.mrf.mxu1  ;;  %v3171_v52 = vor.u32 %v3930_v46, %v3168_v48  ;;  %v4032_v46 = vld [vmem:[#allocation11 + $0x334] sm:$0xf0]  ;;  %v3998_v48 = vld [vmem:[#allocation11 + $0x22c] sm:$0xf]  ;;  %v3440_v49 = vld [vmem:[#allocation11 + $0x238] sm:$0xf0] }
 0x180   :  { %2214 = vmatpush.bf16.msra.mxu0 %v3251_v51  ;;  %2176 = vmatpush.bf16.msrb.mxu1 %v3311_v61  ;;  %v1224_v23 = vadd.f32 %v1223_v5, %v1210_v14  ;;  %v3439_v51 = vor.u32 %v4000_v45, %v3438_v42  ;;  %v4022_v61 = vld [vmem:[#allocation11 + $0x2ec] sm:$0xf]  ;;  %v4044_v5 = vld [vmem:[#allocation11 + $0x394] sm:$0xf0]  ;;  %v3566_v45 = vld [vmem:[#allocation11 + $0x328] sm:$0xf] }
 0x181   :  { %v1235_v6 = vpop.f32.mrf.mxu2  ;;  %2186 = vmatpush.bf16.msrb.mxu2 %v3503_v32  ;;  %v3536_v32 = vld [vmem:[#allocation11 + $0x2f8] sm:$0xf0]  ;;  %v3567_v50 = vor.u32 %v4032_v46, %v3566_v45  ;;  %v4065_v45 = vld [vmem:[#allocation13 + $0x40] sm:$0xff] }
 0x182   :  { %v1249_v10 = vpop.f32.mrf.mxu3  ;;  %v1236_v17 = vadd.f32 %v1235_v6, %v1222_v13  ;;  %v3347_v6 = vor.u32 %v3974_v59, %v3344_v60  ;;  %v3539_v7 = vor.u32 %v4022_v61, %v3536_v32  ;;  %v3520_v13 = vld [vmem:[#allocation11 + $0x2d8] sm:$0xf0]  ;;  %v3667_v60 = vor.u32 %v4054_v57, %v3664_v58  ;;  %v4050_v61 = vld [vmem:[#allocation11 + $0x3cc] sm:$0xf]  ;;  %v4077_v46 = vld [vmem:[#allocation13 + $0xa0] sm:$0xff] }
 0x183   :  { %v3648_v32 = vld [vmem:[#allocation11 + $0x3d8] sm:$0xf0] }
 0x184   :  { %2215 = vmatpush.bf16.msra.mxu0 %v3235_v62  ;;  %2177 = vmatpush.bf16.msrb.mxu1 %v3295_v43  ;;  %v1250_v27 = vadd.f32 %v1249_v10, %v1236_v17  ;;  %v3970_v10 = vld [vmem:[#allocation11 + $0x14c] sm:$0xf]  ;;  %v3647_v43 = vor.u32 %v4052_v9, %v3646_v8 }
 0x185   :  { %2187 = vmatpush.bf16.msrb.mxu2 %v3487_v15  ;;  %v3331_v14 = vor.u32 %v3970_v10, %v3328_v11  ;;  %v3523_v15 = vor.u32 %v4018_v12, %v3520_v13  ;;  %v3966_v17 = vld [vmem:[#allocation11 + $0x12c] sm:$0xf]  ;;  %v3600_v10 = vld [vmem:[#allocation11 + $0x378] sm:$0xf0] }
 0x186   :  { %4132 = vtanh.f32 %v1250_v27  ;;  %v3615_v27 = vor.u32 %v4044_v5, %v3614_v22  ;;  %v4038_v9 = vld [vmem:[#allocation11 + $0x36c] sm:$0xf]  ;;  %v3584_v13 = vld [vmem:[#allocation11 + $0x358] sm:$0xf0]  ;;  %v4059_v22 = vld [vmem:[#allocation13 + $0x10] sm:$0xff] }
 0x187   :  { %2136 = vmatmul.bf16.vlgmr.msra.gmra.mxu2 %v4479_v37  ;;  %2178 = vmatmul.bf16.vlgmr.msrb.gmra.mxu1 %v4475_v53  ;;  %v3603_v11 = vor.u32 %v4038_v9, %v3600_v10  ;;  %v4034_v12 = vld [vmem:[#allocation11 + $0x34c] sm:$0xf]  ;;  %v4071_v5 = vld [vmem:[#allocation13 + $0x70] sm:$0xff] }
 0x188   :  { %2216 = vmatpush.bf16.msra.mxu0 %v3219_v47  ;;  %2226 = vmatpush.bf16.msra.mxu1 %v3411_v18  ;;  %v3630_v47 = vld [vmem:[#allocation11 + $0x3a8] sm:$0xf]  ;;  %v3312_v18 = vld [vmem:[#allocation11 + $0x138] sm:$0xf0] }
 0x189   :  { %v1237_v28 = vpop.f32.mrf.mxu2  ;;  %2188 = vmatpush.bf16.msrb.mxu2 %v3471_v24  ;;  %v3631_v21 = vor.u32 %v4048_v16, %v3630_v47  ;;  %v3296_v24 = vld [vmem:[#allocation11 + $0x118] sm:$0xf0]  ;;  %v4026_v16 = vld [vmem:[#allocation11 + $0x30c] sm:$0xf] }
 0x18a   :  { %v1238_v34 = vadd.f32 %v1237_v28, %v1224_v23  ;;  %v1251_v38 = vpop.f32.mrf.mxu3  ;;  %v3962_v23 = vld [vmem:[#allocation11 + $0x10c] sm:$0xf] }
 0x18b   :  { %v3299_v28 = vor.u32 %v3962_v23, %v3296_v24  ;;  %v4058_v23 = vld [vmem:[#allocation13 + $0x8] sm:$0xff] }
 0x18c   :  { %v1252_v39 = vadd.f32 %v1251_v38, %v1238_v34  ;;  %2217 = vmatpush.bf16.msra.mxu0 %v3203_v25  ;;  %2227 = vmatpush.bf16.msra.mxu1 %v3395_v29  ;;  %v4133_v62 = vpop.eup %4132  ;;  %v4010_v25 = vld [vmem:[#allocation11 + $0x28c] sm:$0xf]  ;;  %v3472_v34 = vld [vmem:[#allocation11 + $0x278] sm:$0xf0]  ;;  %v3582_v38 = vld [vmem:[#allocation11 + $0x348] sm:$0xf] }
 0x18d   :  { %2189 = vmatpush.bf16.msrb.mxu2 %v3455_v40  ;;  %v3491_v29 = vor.u32 %v4010_v25, %v3488_v26  ;;  %v3475_v36 = vor.u32 %v4006_v33, %v3472_v34  ;;  %v4002_v40 = vld [vmem:[#allocation11 + $0x24c] sm:$0xf]  ;;  %v4057_v26 = vld [vmem:[#allocation13] sm:$0xff]  ;;  %v4067_v33 = vld [vmem:[#allocation13 + $0x50] sm:$0xff] }
 0x18e   :  { %4134 = vtanh.f32 %v1252_v39  ;;  %v4036_v39 = vld [vmem:[#allocation11 + $0x354] sm:$0xf0]  ;;  %v4070_v24 = vld [vmem:[#allocation13 + $0x68] sm:$0xff]  ;;  %v4079_v34 = vld [vmem:[#allocation13 + $0xb0] sm:$0xff] }
 0x18f   :  { %v3583_v42 = vor.u32 %v4036_v39, %v3582_v38  ;;  %v4066_v38 = vld [vmem:[#allocation13 + $0x48] sm:$0xff] }
 0x190   :  { %2218 = vmatpush.bf16.msra.mxu0 %v3187_v41  ;;  %2228 = vmatpush.bf16.msra.mxu1 %v3379_v44  ;;  %v3456_v41 = vld [vmem:[#allocation11 + $0x258] sm:$0xf0]  ;;  %v4078_v39 = vld [vmem:[#allocation13 + $0xa8] sm:$0xff] }
 0x191   :  { %2190 = vmatpush.bf16.msrb.mxu2 %v3439_v51  ;;  %v3459_v44 = vor.u32 %v4002_v40, %v3456_v41  ;;  %v3443_v51 = vor.u32 %v3998_v48, %v3440_v49 }
 0x194   :  { %v4135_v63 = vpop.eup %4134  ;;  %2219 = vmatpush.bf16.msra.mxu0 %v3171_v52  ;;  %2229 = vmatpush.bf16.msra.mxu1 %v3363_v56  ;;  %v3550_v52 = vld [vmem:[#allocation11 + $0x308] sm:$0xf]  ;;  %v3424_v56 = vld [vmem:[#allocation11 + $0x218] sm:$0xf0] }
 0x195   :  { %v4487_v4 = vpack.c.bf16 %v4135_v63, %v4133_v62  ;;  %2191 = vmatpush.bf16.msrb.mxu2 %v3423_v0  ;;  %v3551_v59 = vor.u32 %v4028_v54, %v3550_v52  ;;  %v3651_v62 = vor.u32 %v4050_v61, %v3648_v32  ;;  %v4046_v63 = vld [vmem:[#allocation11 + $0x3ac] sm:$0xf]  ;;  %v3632_v0 = vld [vmem:[#allocation11 + $0x3b8] sm:$0xf0] }
 0x196   :  { %v4076_v54 = vld [vmem:[#allocation13 + $0x98] sm:$0xff]  ;;  %v4074_v61 = vld [vmem:[#allocation13 + $0x88] sm:$0xff] }
 0x197   :  { %2094 = vmatmul.bf16.vlgmr.msrb.gmra.mxu3 %v4487_v4  ;;  %2220 = vmatmul.bf16.vlgmr.msra.gmra.mxu0 %v4471_v2  ;;  %v3315_v2 = vor.u32 %v3966_v17, %v3312_v18  ;;  %v4064_v18 = vld [vmem:[#allocation13 + $0x38] sm:$0xff] }
 0x198   :  { %2198 = vmatpush.bf16.msrb.mxu3 %v3663_v3  ;;  %2230 = vmatpush.bf16.msra.mxu1 %v3347_v6  ;;  %v3635_v3 = vor.u32 %v4046_v63, %v3632_v0  ;;  %v4042_v6 = vld [vmem:[#allocation11 + $0x38c] sm:$0xf]  ;;  %v4088_v32 = vld [vmem:[#allocation13 + $0xf8] sm:$0xff] }
 0x199   :  { %2240 = vmatpush.bf16.msra.mxu2 %v3539_v7  ;;  %v3616_v7 = vld [vmem:[#allocation11 + $0x398] sm:$0xf0]  ;;  %2540 = vmatpush.bf16.msrb.mxu0 %v4064_v18 }
 0x19a   :  { %2192 = vmatmul.bf16.vlgmr.msrb.gmra.mxu2 %v4479_v37  ;;  %v3619_v8 = vor.u32 %v4042_v6, %v3616_v7 }
 0x19c   :  { %2199 = vmatpush.bf16.msrb.mxu3 %v3647_v43  ;;  %2231 = vmatpush.bf16.msra.mxu1 %v3331_v14  ;;  %v3587_v43 = vor.u32 %v4034_v12, %v3584_v13  ;;  %v4030_v14 = vld [vmem:[#allocation11 + $0x32c] sm:$0xf] }
 0x19d   :  { %2241 = vmatpush.bf16.msra.mxu2 %v3523_v15  ;;  %v3568_v15 = vld [vmem:[#allocation11 + $0x338] sm:$0xf0]  ;;  %2541 = vmatpush.bf16.msrb.mxu0 %v4063_v19 }
 0x19e   :  { %v3571_v47 = vor.u32 %v4030_v14, %v3568_v15  ;;  %v4087_v14 = vld [vmem:[#allocation13 + $0xf0] sm:$0xff] }
 0x1a0   :  { %2200 = vmatpush.bf16.msrb.mxu3 %v3631_v21  ;;  %2232 = vmatpush.bf16.msra.mxu1 %v3315_v2  ;;  %v4061_v21 = vld [vmem:[#allocation13 + $0x20] sm:$0xff]  ;;  %v4060_v2 = vld [vmem:[#allocation13 + $0x18] sm:$0xff] }
 0x1a1   :  { %2242 = vmatpush.bf16.msra.mxu2 %v3507_v1  ;;  %2542 = vmatpush.bf16.msrb.mxu0 %v4062_v20  ;;  %v4072_v1 = vld [vmem:[#allocation13 + $0x78] sm:$0xff] }
 0x1a4   :  { %2201 = vmatpush.bf16.msrb.mxu3 %v3615_v27  ;;  %2233 = vmatpush.bf16.msra.mxu1 %v3299_v28  ;;  %v4069_v27 = vld [vmem:[#allocation13 + $0x60] sm:$0xff] }
 0x1a5   :  { %2243 = vmatpush.bf16.msra.mxu2 %v3491_v29  ;;  %2543 = vmatpush.bf16.msrb.mxu0 %v4061_v21  ;;  %v4068_v29 = vld [vmem:[#allocation13 + $0x58] sm:$0xff] }
 0x1a7   :  { %2150 = vmatmul.bf16.vlgmr.msra.gmra.mxu3 %v4487_v4  ;;  %2234 = vmatmul.bf16.vlgmr.msra.gmra.mxu1 %v4475_v53  ;;  %v3427_v53 = vor.u32 %v3994_v55, %v3424_v56 }
 0x1a8   :  { %2202 = vmatpush.bf16.msrb.mxu3 %v3599_v35  ;;  %2554 = vmatpush.bf16.msrb.mxu1 %v4072_v1  ;;  %v4500_v35 = vld [vmem:[%s4518_s6] sm:$0xf]  ;;  %v4085_v1 = vld [vmem:[#allocation13 + $0xe0] sm:$0xff] }
 0x1a9   :  { %2244 = vmatpush.bf16.msra.mxu2 %v3475_v36  ;;  %2544 = vmatpush.bf16.msrb.mxu0 %v4060_v2  ;;  %v1396_v40 = vperm.slane %v4500_v35, 0  ;;  %v1398_v2 = vperm.slane %v4500_v35, 2 }
 0x1ac   :  { %2203 = vmatpush.bf16.msrb.mxu3 %v3583_v42  ;;  %2555 = vmatpush.bf16.msrb.mxu1 %v4071_v5 }
 0x1ad   :  { %2245 = vmatpush.bf16.msra.mxu2 %v3459_v44  ;;  %2545 = vmatpush.bf16.msrb.mxu0 %v4059_v22 }
 0x1b0   :  { %2204 = vmatpush.bf16.msrb.mxu3 %v3567_v50  ;;  %2556 = vmatpush.bf16.msrb.mxu1 %v4070_v24 }
 0x1b1   :  { %2246 = vmatpush.bf16.msra.mxu2 %v3443_v51  ;;  %2546 = vmatpush.bf16.msrb.mxu0 %v4058_v23 }
 0x1b4   :  { %2205 = vmatpush.bf16.msrb.mxu3 %v3551_v59  ;;  %2557 = vmatpush.bf16.msrb.mxu1 %v4069_v27 }
 0x1b5   :  { %2247 = vmatpush.bf16.msra.mxu2 %v3427_v53  ;;  %2547 = vmatpush.bf16.msrb.mxu0 %v4057_v26  ;;  %v4075_v53 = vld [vmem:[#allocation13 + $0x90] sm:$0xff] }
 0x1b7   :  { %2206 = vmatmul.bf16.vlgmr.msrb.gmra.mxu3 %v4487_v4 }
 0x1b8   :  { %2254 = vmatpush.bf16.msra.mxu3 %v3667_v60  ;;  %2248 = vmatmul.bf16.vlgmr.msra.gmra.mxu2 %v4479_v37  ;;  %v3552_v37 = vld [vmem:[#allocation11 + $0x318] sm:$0xf0] }
 0x1b9   :  { %v3555_v17 = vor.u32 %v4026_v16, %v3552_v37  ;;  %2558 = vmatpush.bf16.msrb.mxu1 %v4068_v29  ;;  %2568 = vmatpush.bf16.msrb.mxu2 %v4080_v30  ;;  %v4086_v37 = vld [vmem:[#allocation13 + $0xe8] sm:$0xff] }
 0x1bc   :  { %2255 = vmatpush.bf16.msra.mxu3 %v3651_v62  ;;  %v1397_v62 = vperm.slane %v4500_v35, 1 }
 0x1bd   :  { %2559 = vmatpush.bf16.msrb.mxu1 %v4067_v33  ;;  %2569 = vmatpush.bf16.msrb.mxu2 %v4079_v34  ;;  %v4083_v33 = vld [vmem:[#allocation13 + $0xd0] sm:$0xff] }
 0x1c0   :  { %2256 = vmatpush.bf16.msra.mxu3 %v3635_v3  ;;  %v4073_v3 = vld [vmem:[#allocation13 + $0x80] sm:$0xff] }
 0x1c1   :  { %2560 = vmatpush.bf16.msrb.mxu1 %v4066_v38  ;;  %2570 = vmatpush.bf16.msrb.mxu2 %v4078_v39 }
 0x1c4   :  { %2257 = vmatpush.bf16.msra.mxu3 %v3619_v8 }
 0x1c5   :  { %2561 = vmatpush.bf16.msrb.mxu1 %v4065_v45  ;;  %2571 = vmatpush.bf16.msrb.mxu2 %v4077_v46 }
 0x1c8   :  { %2258 = vmatpush.bf16.msra.mxu3 %v3603_v11 }
 0x1c9   :  { %2572 = vmatpush.bf16.msrb.mxu2 %v4076_v54 }
 0x1cc   :  { %2259 = vmatpush.bf16.msra.mxu3 %v3587_v43 }
 0x1cd   :  { %2573 = vmatpush.bf16.msrb.mxu2 %v4075_v53 }
 0x1d0   :  { %2260 = vmatpush.bf16.msra.mxu3 %v3571_v47 }
 0x1d1   :  { %2574 = vmatpush.bf16.msrb.mxu2 %v4074_v61 }
 0x1d4   :  { %2261 = vmatpush.bf16.msra.mxu3 %v3555_v17  ;;  %v2053_v25 = vpop.f32.mrf.mxu0 }
 0x1d5   :  { %v2054_v42 = vadd.f32 %v2053_v25, %v1396_v40  ;;  %2575 = vmatpush.bf16.msrb.mxu2 %v4073_v3  ;;  %v4084_v25 = vld [vmem:[#allocation13 + $0xd8] sm:$0xff] }
 0x1d7   :  { %2262 = vmatmul.bf16.vlgmr.msra.gmra.mxu3 %v4487_v4 }
 0x1d8   :  { %2582 = vmatpush.bf16.msrb.mxu3 %v4088_v32 }
 0x1dc   :  { %v2055_v31 = vpop.f32.mrf.mxu0  ;;  %2583 = vmatpush.bf16.msrb.mxu3 %v4087_v14 }
 0x1dd   :  { %v2056_v50 = vadd.f32 %v2055_v31, %v1396_v40  ;;  %v4082_v40 = vld [vmem:[#allocation13 + $0xc8] sm:$0xff] }
 0x1e0   :  { %2584 = vmatpush.bf16.msrb.mxu3 %v4086_v37 }
 0x1e4   :  { %v2067_v4 = vpop.f32.mrf.mxu1  ;;  %v2109_v49 = vpop.f32.mrf.mxu0  ;;  %2585 = vmatpush.bf16.msrb.mxu3 %v4085_v1 }
 0x1e5   :  { %v2068_v48 = vadd.f32 %v2067_v4, %v2054_v42  ;;  %v2110_v7 = vadd.f32 %v2109_v49, %v1397_v62  ;;  %v4081_v42 = vld [vmem:[#allocation13 + $0xc0] sm:$0xff] }
 0x1e8   :  { %2586 = vmatpush.bf16.msrb.mxu3 %v4084_v25 }
 0x1ec   :  { %v2069_v36 = vpop.f32.mrf.mxu1  ;;  %v2111_v63 = vpop.f32.mrf.mxu0  ;;  %2587 = vmatpush.bf16.msrb.mxu3 %v4083_v33 }
 0x1ed   :  { %v2070_v55 = vadd.f32 %v2069_v36, %v2056_v50  ;;  %v2112_v13 = vadd.f32 %v2111_v63, %v1397_v62 }
 0x1f0   :  { %2588 = vmatpush.bf16.msrb.mxu3 %v4082_v40 }
 0x1f4   :  { %v2123_v51 = vpop.f32.mrf.mxu1  ;;  %2589 = vmatpush.bf16.msrb.mxu3 %v4081_v42 }
 0x1f5   :  { %v2124_v11 = vadd.f32 %v2123_v51, %v2110_v7  ;;  %v1399_v51 = vperm.slane %v4500_v35, 3  ;;  %v4103_v7 = vld [vmem:[%s4520_s8] ss:$0 sm:$0xff]  ;;  %s4366_s8 = smov 128  }
 0x1f6   :  { %v2165_v47 = vpop.f32.mrf.mxu0 }
 0x1f7   :  { %v2166_v5 = vadd.f32 %v2165_v47, %v1398_v2 }
 0x1fa   :  { %v2081_v28 = vpop.f32.mrf.mxu2 }
 0x1fb   :  { %v2082_v52 = vadd.f32 %v2081_v28, %v2068_v48 }
 0x1fc   :  { %v2125_v0 = vpop.f32.mrf.mxu1 }
 0x1fd   :  { %v2126_v15 = vadd.f32 %v2125_v0, %v2112_v13 }
 0x1fe   :  { %v2167_v23 = vpop.f32.mrf.mxu0 }
 0x1ff   :  { %v2168_v29 = vadd.f32 %v2167_v23, %v1398_v2 }
 0x202   :  { %v2083_v41 = vpop.f32.mrf.mxu2 }
 0x203   :  { %v2084_v58 = vadd.f32 %v2083_v41, %v2070_v55 }
 0x204   :  { %v2179_v18 = vpop.f32.mrf.mxu1 }
 0x205   :  { %v2180_v26 = vadd.f32 %v2179_v18, %v2166_v5 }
 0x20a   :  { %v2137_v56 = vpop.f32.mrf.mxu2 }
 0x20b   :  { %v2138_v43 = vadd.f32 %v2137_v56, %v2124_v11 }
 0x20c   :  { %v2181_v27 = vpop.f32.mrf.mxu1 }
 0x20d   :  { %v2182_v34 = vadd.f32 %v2181_v27, %v2168_v29 }
 0x212   :  { %v2139_v8 = vpop.f32.mrf.mxu2 }
 0x213   :  { %v2140_v17 = vadd.f32 %v2139_v8, %v2126_v15 }
 0x214   :  { %v2221_v48 = vpop.f32.mrf.mxu0 }
 0x21a   :  { %v2095_v44 = vpop.f32.mrf.mxu3 }
 0x21b   :  { %v2096_v57 = vadd.f32 %v2095_v44, %v2082_v52  ;;  %v2222_v52 = vadd.f32 %v2221_v48, %v1399_v51 }
 0x21c   :  { %v2223_v54 = vpop.f32.mrf.mxu0 }
 0x21d   :  { %4136 = vtanh.f32 %v2096_v57  ;;  %v2193_v21 = vpop.f32.mrf.mxu2 }
 0x21e   :  { %v2194_v30 = vadd.f32 %v2193_v21, %v2180_v26 }
 0x222   :  { %v2097_v59 = vpop.f32.mrf.mxu3 }
 0x223   :  { %v2098_v60 = vadd.f32 %v2097_v59, %v2084_v58  ;;  %v4137_v6 = vpop.eup %4136  ;;  %v2224_v58 = vadd.f32 %v2223_v54, %v1399_v51 }
 0x224   :  { %v2235_v49 = vpop.f32.mrf.mxu1 }
 0x225   :  { %4138 = vtanh.f32 %v2098_v60  ;;  %v2195_v31 = vpop.f32.mrf.mxu2  ;;  %v2236_v56 = vadd.f32 %v2235_v49, %v2222_v52 }
 0x226   :  { %v2196_v38 = vadd.f32 %v2195_v31, %v2182_v34 }
 0x22a   :  { %v2151_v9 = vpop.f32.mrf.mxu3 }
 0x22b   :  { %v4139_v10 = vpop.eup %4138  ;;  %v2152_v16 = vadd.f32 %v2151_v9, %v2138_v43 }
 0x22c   :  { %v2276_v12 = vpack.c.bf16 %v4139_v10, %v4137_v6  ;;  %v2237_v57 = vpop.f32.mrf.mxu1 }
 0x22d   :  { %4140 = vtanh.f32 %v2152_v16  ;;  %v2238_v60 = vadd.f32 %v2237_v57, %v2224_v58 }
 0x22e   :  { %2548 = vmatmul.bf16.vlgmr.msrb.gmra.mxu0 %v2276_v12 }
 0x232   :  { %v2153_v19 = vpop.f32.mrf.mxu3 }
 0x233   :  { %v2154_v20 = vadd.f32 %v2153_v19, %v2140_v17  ;;  %v4141_v22 = vpop.eup %4140 }
 0x235   :  { %4142 = vtanh.f32 %v2154_v20 }
 0x23a   :  { %v2207_v24 = vpop.f32.mrf.mxu3 }
 0x23b   :  { %v4143_v4 = vpop.eup %4142  ;;  %v2208_v36 = vadd.f32 %v2207_v24, %v2194_v30  ;;  %v2249_v50 = vpop.f32.mrf.mxu2 }
 0x23c   :  { %v2277_v28 = vpack.c.bf16 %v4143_v4, %v4141_v22  ;;  %v2250_v59 = vadd.f32 %v2249_v50, %v2236_v56 }
 0x23d   :  { %4144 = vtanh.f32 %v2208_v36 }
 0x23e   :  { %2562 = vmatmul.bf16.vlgmr.msrb.gmra.mxu1 %v2277_v28 }
 0x242   :  { %v2209_v39 = vpop.f32.mrf.mxu3 }
 0x243   :  { %v2210_v41 = vadd.f32 %v2209_v39, %v2196_v38  ;;  %v4145_v44 = vpop.eup %4144  ;;  %v2251_v53 = vpop.f32.mrf.mxu2 }
 0x244   :  { %v2252_v32 = vadd.f32 %v2251_v53, %v2238_v60 }
 0x245   :  { %4146 = vtanh.f32 %v2210_v41 }
 0x24b   :  { %v4147_v45 = vpop.eup %4146 }
 0x24c   :  { %v2278_v46 = vpack.c.bf16 %v4147_v45, %v4145_v44 }
 0x24e   :  { %2576 = vmatmul.bf16.vlgmr.msrb.gmra.mxu2 %v2278_v46 }
 0x25a   :  { %v2263_v55 = vpop.f32.mrf.mxu3 }
 0x25b   :  { %v2264_v61 = vadd.f32 %v2263_v55, %v2250_v59 }
 0x25d   :  { %4148 = vtanh.f32 %v2264_v61 }
 0x262   :  { %v2265_v62 = vpop.f32.mrf.mxu3 }
 0x263   :  { %v2266_v63 = vadd.f32 %v2265_v62, %v2252_v32  ;;  %v4149_v0 = vpop.eup %4148 }
 0x265   :  { %4150 = vtanh.f32 %v2266_v63 }
 0x26b   :  { %v4151_v3 = vpop.eup %4150 }
 0x26c   :  { %v2279_v6 = vpack.c.bf16 %v4151_v3, %v4149_v0 }
 0x26e   :  { %2590 = vmatmul.bf16.vlgmr.msrb.gmra.mxu3 %v2279_v6 }
 0x2ab   :  { %v2549_v35 = vpop.f32.mrf.mxu0 }
 0x2ac   :  { %v2550_v10 = vadd.f32 %v4103_v7, %v2549_v35 }
 0x2b3   :  { %v2551_v13 = vpop.f32.mrf.mxu0 }
 0x2b4   :  { %v2552_v47 = vadd.f32 %v4103_v7, %v2551_v13 }
 0x2bb   :  { %v2563_v8 = vpop.f32.mrf.mxu1 }
 0x2bc   :  { %v2564_v11 = vadd.f32 %v2563_v8, %v2550_v10 }
 0x2c3   :  { %v2565_v15 = vpop.f32.mrf.mxu1 }
 0x2c4   :  { %v2566_v37 = vadd.f32 %v2565_v15, %v2552_v47 }
 0x2d1   :  { %v2577_v9 = vpop.f32.mrf.mxu2 }
 0x2d2   :  { %v2578_v12 = vadd.f32 %v2577_v9, %v2564_v11 }
 0x2d9   :  { %v2579_v16 = vpop.f32.mrf.mxu2 }
 0x2da   :  { %v2580_v17 = vadd.f32 %v2579_v16, %v2566_v37 }
 0x2f1   :  { %v2591_v43 = vpop.f32.mrf.mxu3 }
 0x2f2   :  { %v2592_v14 = vadd.f32 %v2591_v43, %v2578_v12 }
 0x2f4   :  { %2596 = vst [vmem:[#allocation14] sm:$0xff] %v2592_v14 }
 0x2f9   :  { %v2593_v18 = vpop.f32.mrf.mxu3 }
 0x2fa   :  { %v2594_v19 = vadd.f32 %v2593_v18, %v2580_v17 }
 0x2fc   :  { %2597 = vst [vmem:[#allocation14 + $0x8] sm:$0xff] %v2594_v19 }
 0x2fd   :  { %2610 = dma.vmem_to_hbm [thread:$0]  %s2603_s1, 256, %s2605_s26, [#allocation4], %s4366_s8, %s4366_s8, %s4367_s27  }
 0x2fe   :  { %4352 = dma.done.wait [#allocation4], 256  }
 0x2ff   :  { %4353 = vsyncadd [#allocation4], 4294967040 }
 0x300   :  { %2615 = vsyncpa [#allocation3], 1 }
 0x301   :  { %2616 = vsyncpa [#allocation6], 1 }
 0x302   :  { %2617 = vsyncpa [#allocation9], 1 }
 0x303   :  { %2618 = vsyncpa [#allocation12], 1 }
 0x304   :  { %2619 = vsyncpa [#allocation4], 1 }

</bundles_post_ra>
